<compile_context>
chip_gen: v5e
topology: v5e:2x2
jax: 0.10.0
libtpu: 0.0.40
codegen_flags: <defaults>
</compile_context>

<pallas_src>
import jax
import jax.numpy as jnp
from jax.experimental import pallas as pl
from jax.experimental.pallas import tpu as pltpu

K_IN = 784          # PyTorch flattens 1x28x28 -> 784
H1 = 512
H2 = 256


def _round_up(x, m):
    return ((x + m - 1) // m) * m


def _cdiv(a, b):
    return -(-a // b)


def _leaky_relu(x, slope=0.2):
    # max(x, slope*x) == LeakyReLU(slope) for 0 < slope < 1; 2 VALU ops.
    return jnp.maximum(x, slope * x)


def discriminator_kernel(x_ref, w1_ref, b1_ref, w2_ref, b2_ref, w3t_ref,
                         b3_ref, o_ref):
    # In-kernel cast f32 -> bf16 (hidden under the layer-1 matmul).
    x = x_ref[...].astype(jnp.bfloat16)

    # Layer 1: [TB, 784](bf16) @ [784, 512](bf16) -> f32 acc, + bias, LeakyReLU
    h1 = jnp.dot(x, w1_ref[...],
                 preferred_element_type=jnp.float32) + b1_ref[...]
    h1 = _leaky_relu(h1)

    # Layer 2: [TB, 512](bf16) @ [512, 256](bf16) -> f32 acc, + bias, LeakyReLU
    h2 = jnp.dot(h1.astype(jnp.bfloat16), w2_ref[...],
                 preferred_element_type=jnp.float32) + b2_ref[...]
    h2 = _leaky_relu(h2)

    # Layer 3 (256 -> 1): VPU multiply + XLU cross-lane reduce instead of an
    # N=1 MXU matmul.  w3t is the transposed weight row [1, 256] in f32.
    h3 = jnp.sum(h2 * w3t_ref[...], axis=-1, keepdims=True) + b3_ref[...]

    # Output last dim is 1 (< 128 lanes) -> masked vst, but bytes are ~1 KiB
    # per tile so the lane-dense layout trick isn't worth a transpose.
    o_ref[...] = jax.nn.sigmoid(h3)


def prepare_discriminator_params(params):
    """One-time (per optimizer step) weight prep: bf16 casts + w3 transpose.

    Hoisted out of the hot forward so the discriminator's two calls per GAN
    step (real + fake) don't repeat ~2.5 MB of casts / tiny serialized XLA ops.
    """
    return {
        "w1": params["w1"].astype(jnp.bfloat16),          # (784, 512)
        "b1": params["b1"].astype(jnp.float32),            # (1, 512)
        "w2": params["w2"].astype(jnp.bfloat16),           # (512, 256)
        "b2": params["b2"].astype(jnp.float32),             # (1, 256)
        "w3t": params["w3"].T.astype(jnp.float32),           # (1, 256)
        "b3": params["b3"].astype(jnp.float32),               # (1, 1)
    }


def _select_tiles(B, tile_b):
    """Pick (TB, B_pad, n_tiles): derive the tile from the batch, pad <= 7 rows,
    and keep >= 2 grid steps when possible so v7x's 2nd TensorCore has work."""
    n_tiles = max(1, _cdiv(B, tile_b))
    if n_tiles == 1 and B >= 16:
        n_tiles = 2
    TB = _round_up(_cdiv(B, n_tiles), 8)
    B_pad = n_tiles * TB
    return TB, B_pad, n_tiles


def discriminator_forward(img, prepared, tile_b=1024):
    """img: [B, 784] float32.  prepared: output of prepare_discriminator_params."""
    B = img.shape[0]
    TB, B_pad, n_tiles = _select_tiles(B, tile_b)

    # Only batch padding (if any); no K padding, no dtype cast pre-pass.
    x = img if B_pad == B else jnp.pad(img, ((0, B_pad - B), (0, 0)))

    const = lambda shape: pl.BlockSpec(shape, lambda i: (0, 0))

    flops = 2 * B_pad * (K_IN * H1 + H1 * H2 + H2)
    bytes_accessed = (B_pad * K_IN * 4                       # x (f32)
                      + (K_IN * H1 + H1 * H2) * 2            # w1, w2 (bf16)
                      + (H1 + H2 + H2 + 1 + 1) * 4           # biases + w3t (f32)
                      + B_pad * 4)                           # output (f32)

    out = pl.pallas_call(
        discriminator_kernel,
        out_shape=jax.ShapeDtypeStruct((B_pad, 1), jnp.float32),
        grid=(n_tiles,),
        in_specs=[
            pl.BlockSpec((TB, K_IN), lambda i: (i, 0)),      # x: tiled on batch
            const((K_IN, H1)), const((1, H1)),               # w1, b1 (resident)
            const((H1, H2)), const((1, H2)),                 # w2, b2 (resident)
            const((1, H2)), const((1, 1)),                   # w3t, b3 (resident)
        ],
        out_specs=pl.BlockSpec((TB, 1), lambda i: (i, 0)),
        compiler_params=pltpu.CompilerParams(
            dimension_semantics=("parallel",)),
        cost_estimate=pl.CostEstimate(
            flops=flops, transcendentals=2 * B_pad,           # sigmoid = exp + recip
            bytes_accessed=bytes_accessed),
    )(x, prepared["w1"], prepared["b1"], prepared["w2"], prepared["b2"],
      prepared["w3t"], prepared["b3"])

    return out[:B]


def init_params(key):
    """Deterministic init mirroring nn.Linear's U(-1/sqrt(fan_in), 1/sqrt(fan_in))."""
    dims = [(K_IN, H1), (H1, H2), (H2, 1)]
    params = {}
    keys = jax.random.split(key, 2 * len(dims))
    for i, (fin, fout) in enumerate(dims):
        bound = 1.0 / jnp.sqrt(jnp.float32(fin))
        params[f"w{i+1}"] = jax.random.uniform(
            keys[2 * i], (fin, fout), jnp.float32, minval=-bound, maxval=bound)
        params[f"b{i+1}"] = jax.random.uniform(
            keys[2 * i + 1], (1, fout), jnp.float32, minval=-bound, maxval=bound)
    return params


if __name__ == "__main__":
    key = jax.random.PRNGKey(0)
    pkey, xkey = jax.random.split(key)
    params = init_params(pkey)

    # Weight prep done once, outside the hot forward.
    prepared = jax.tree_util.tree_map(jax.block_until_ready,
                                      prepare_discriminator_params(params))

    B = 64
    img = jax.random.normal(xkey, (B, K_IN), dtype=jnp.float32)

    fwd = jax.jit(discriminator_forward)
    out = jax.block_until_ready(fwd(img, prepared))

    # sanity: shape [B,1], values in (0,1) from sigmoid
    assert out.shape == (B, 1)
    assert bool(jnp.all((out > 0.0) & (out < 1.0)))

    # Reference 1: same bf16 matmul recipe as the kernel (tight tolerance).
    def ref_bf16(x, p):
        h = jnp.dot(x.astype(jnp.bfloat16), p["w1"].astype(jnp.bfloat16),
                    preferred_element_type=jnp.float32) + p["b1"]
        h = jnp.maximum(h, 0.2 * h)
        h = jnp.dot(h.astype(jnp.bfloat16), p["w2"].astype(jnp.bfloat16),
                    preferred_element_type=jnp.float32) + p["b2"]
        h = jnp.maximum(h, 0.2 * h)
        h = jnp.sum(h * p["w3"].T, axis=-1, keepdims=True) + p["b3"]
        return jax.nn.sigmoid(h)

    assert bool(jnp.allclose(out, ref_bf16(img, params), atol=1e-3, rtol=1e-3))

    # Reference 2: pure f32 (the PyTorch module's semantics); looser tolerance
    # accounts for the bf16 MXU inputs.
    def ref_f32(x, p):
        h = x @ p["w1"] + p["b1"]
        h = jnp.where(h > 0, h, 0.2 * h)
        h = h @ p["w2"] + p["b2"]
        h = jnp.where(h > 0, h, 0.2 * h)
        h = h @ p["w3"] + p["b3"]
        return jax.nn.sigmoid(h)

    assert bool(jnp.allclose(out, ref_f32(img, params), atol=2e-2, rtol=2e-2))

    # Odd-batch path: exercises minimal batch padding + multi-tile grid.
    B2 = 300
    img2 = jax.random.normal(jax.random.PRNGKey(1), (B2, K_IN), dtype=jnp.float32)
    out2 = jax.block_until_ready(fwd(img2, prepared))
    assert out2.shape == (B2, 1)
    assert bool(jnp.allclose(out2, ref_f32(img2, params), atol=2e-2, rtol=2e-2))

    print("KERNEL_OK")
</pallas_src>

<mosaic_0001>
module attributes {stable_mosaic.version = 11 : i64} {
  func.func @discriminator_kernel(%arg0: i32, %arg1: memref<32x784xf32, #tpu.memory_space<vmem>>, %arg2: memref<784x512xbf16, #tpu.memory_space<vmem>>, %arg3: memref<1x512xf32, #tpu.memory_space<vmem>>, %arg4: memref<512x256xbf16, #tpu.memory_space<vmem>>, %arg5: memref<1x256xf32, #tpu.memory_space<vmem>>, %arg6: memref<1x256xf32, #tpu.memory_space<vmem>>, %arg7: memref<1x1xf32, #tpu.memory_space<vmem>>, %arg8: memref<32x1xf32, #tpu.memory_space<vmem>>) attributes {dimension_semantics = [#tpu.dimension_semantics<parallel>], iteration_bounds = array<i64: 2>, scalar_prefetch = 0 : i64, scratch_operands = 0 : i64, tpu.core_type = #tpu.core_type<tc>, window_params = [{transform_indices = @transform_0, window_bounds = array<i64: 32, 784>}, {pipeline_mode = #tpu.pipeline_mode<synchronous>, transform_indices = @transform_1, window_bounds = array<i64: 784, 512>}, {pipeline_mode = #tpu.pipeline_mode<synchronous>, transform_indices = @transform_2, window_bounds = array<i64: 1, 512>}, {pipeline_mode = #tpu.pipeline_mode<synchronous>, transform_indices = @transform_3, window_bounds = array<i64: 512, 256>}, {pipeline_mode = #tpu.pipeline_mode<synchronous>, transform_indices = @transform_4, window_bounds = array<i64: 1, 256>}, {pipeline_mode = #tpu.pipeline_mode<synchronous>, transform_indices = @transform_5, window_bounds = array<i64: 1, 256>}, {pipeline_mode = #tpu.pipeline_mode<synchronous>, transform_indices = @transform_6, window_bounds = array<i64: 1, 1>}, {transform_indices = @transform_7, window_bounds = array<i64: 32, 1>}]} {
    %c0 = arith.constant 0 : index
    %c0_0 = arith.constant 0 : index
    %0 = vector.load %arg1[%c0, %c0_0] : memref<32x784xf32, #tpu.memory_space<vmem>>, vector<32x784xf32>
    %1 = arith.truncf %0 : vector<32x784xf32> to vector<32x784xbf16>
    %c0_1 = arith.constant 0 : index
    %c0_2 = arith.constant 0 : index
    %2 = vector.load %arg2[%c0_1, %c0_2] : memref<784x512xbf16, #tpu.memory_space<vmem>>, vector<784x512xbf16>
    %cst = arith.constant dense<0.000000e+00> : vector<32x512xf32>
    %3 = tpu.matmul %1, %2, %cst {dimension_numbers = #tpu.dot_dimension_numbers<[1], [0], [0], [1], [0, 0, 1, 1], [], []>} : vector<32x784xbf16>, vector<784x512xbf16>, vector<32x512xf32> -> vector<32x512xf32>
    %c0_3 = arith.constant 0 : index
    %c0_4 = arith.constant 0 : index
    %4 = vector.load %arg3[%c0_3, %c0_4] : memref<1x512xf32, #tpu.memory_space<vmem>>, vector<1x512xf32>
    %5 = vector.broadcast %4 : vector<1x512xf32> to vector<32x512xf32>
    %6 = arith.addf %3, %5 : vector<32x512xf32>
    %cst_5 = arith.constant 2.000000e-01 : f32
    %7 = vector.broadcast %cst_5 : f32 to vector<32x512xf32>
    %8 = arith.mulf %7, %6 : vector<32x512xf32>
    %9 = arith.maximumf %6, %8 : vector<32x512xf32>
    %10 = arith.truncf %9 : vector<32x512xf32> to vector<32x512xbf16>
    %c0_6 = arith.constant 0 : index
    %c0_7 = arith.constant 0 : index
    %11 = vector.load %arg4[%c0_6, %c0_7] : memref<512x256xbf16, #tpu.memory_space<vmem>>, vector<512x256xbf16>
    %cst_8 = arith.constant dense<0.000000e+00> : vector<32x256xf32>
    %12 = tpu.matmul %10, %11, %cst_8 {dimension_numbers = #tpu.dot_dimension_numbers<[1], [0], [0], [1], [0, 0, 1, 1], [], []>} : vector<32x512xbf16>, vector<512x256xbf16>, vector<32x256xf32> -> vector<32x256xf32>
    %c0_9 = arith.constant 0 : index
    %c0_10 = arith.constant 0 : index
    %13 = vector.load %arg5[%c0_9, %c0_10] : memref<1x256xf32, #tpu.memory_space<vmem>>, vector<1x256xf32>
    %14 = vector.broadcast %13 : vector<1x256xf32> to vector<32x256xf32>
    %15 = arith.addf %12, %14 : vector<32x256xf32>
    %cst_11 = arith.constant 2.000000e-01 : f32
    %16 = vector.broadcast %cst_11 : f32 to vector<32x256xf32>
    %17 = arith.mulf %16, %15 : vector<32x256xf32>
    %18 = arith.maximumf %15, %17 : vector<32x256xf32>
    %c0_12 = arith.constant 0 : index
    %c0_13 = arith.constant 0 : index
    %19 = vector.load %arg6[%c0_12, %c0_13] : memref<1x256xf32, #tpu.memory_space<vmem>>, vector<1x256xf32>
    %20 = vector.broadcast %19 : vector<1x256xf32> to vector<32x256xf32>
    %21 = arith.mulf %18, %20 : vector<32x256xf32>
    %cst_14 = arith.constant dense<0.000000e+00> : vector<32xf32>
    %22 = vector.multi_reduction <add>, %21, %cst_14 [1] : vector<32x256xf32> to vector<32xf32>
    %23 = vector.shape_cast %22 : vector<32xf32> to vector<32x1xf32>
    %c0_15 = arith.constant 0 : index
    %c0_16 = arith.constant 0 : index
    %24 = vector.load %arg7[%c0_15, %c0_16] : memref<1x1xf32, #tpu.memory_space<vmem>>, vector<1x1xf32>
    %25 = vector.broadcast %24 : vector<1x1xf32> to vector<32x1xf32>
    %26 = arith.addf %23, %25 : vector<32x1xf32>
    %27 = arith.negf %26 : vector<32x1xf32>
    %28 = math.exp %27 : vector<32x1xf32>
    %cst_17 = arith.constant 1.000000e+00 : f32
    %29 = vector.broadcast %cst_17 : f32 to vector<32x1xf32>
    %30 = arith.addf %29, %28 : vector<32x1xf32>
    %31 = arith.divf %29, %30 : vector<32x1xf32>
    %c0_18 = arith.constant 0 : index
    %c0_19 = arith.constant 0 : index
    %32 = vector.load %arg8[%c0_18, %c0_19] : memref<32x1xf32, #tpu.memory_space<vmem>>, vector<32x1xf32>
    tpu.vector_store %arg8[%c0_18, %c0_19], %31 {strides = array<i32>} : memref<32x1xf32, #tpu.memory_space<vmem>>, vector<32x1xf32>,
    return
  }
  func.func @transform_0(%arg0: i32) -> (i32, i32) {
    %c0_i32 = arith.constant 0 : i32
    %c0_i32_0 = arith.constant 0 : i32
    return %arg0, %c0_i32 : i32, i32
  }
  func.func @transform_1(%arg0: i32) -> (i32, i32) {
    %c0_i32 = arith.constant 0 : i32
    %c0_i32_0 = arith.constant 0 : i32
    %c0_i32_1 = arith.constant 0 : i32
    return %c0_i32, %c0_i32_0 : i32, i32
  }
  func.func @transform_2(%arg0: i32) -> (i32, i32) {
    %c0_i32 = arith.constant 0 : i32
    %c0_i32_0 = arith.constant 0 : i32
    %c0_i32_1 = arith.constant 0 : i32
    return %c0_i32, %c0_i32_0 : i32, i32
  }
  func.func @transform_3(%arg0: i32) -> (i32, i32) {
    %c0_i32 = arith.constant 0 : i32
    %c0_i32_0 = arith.constant 0 : i32
    %c0_i32_1 = arith.constant 0 : i32
    return %c0_i32, %c0_i32_0 : i32, i32
  }
  func.func @transform_4(%arg0: i32) -> (i32, i32) {
    %c0_i32 = arith.constant 0 : i32
    %c0_i32_0 = arith.constant 0 : i32
    %c0_i32_1 = arith.constant 0 : i32
    return %c0_i32, %c0_i32_0 : i32, i32
  }
  func.func @transform_5(%arg0: i32) -> (i32, i32) {
    %c0_i32 = arith.constant 0 : i32
    %c0_i32_0 = arith.constant 0 : i32
    %c0_i32_1 = arith.constant 0 : i32
    return %c0_i32, %c0_i32_0 : i32, i32
  }
  func.func @transform_6(%arg0: i32) -> (i32, i32) {
    %c0_i32 = arith.constant 0 : i32
    %c0_i32_0 = arith.constant 0 : i32
    %c0_i32_1 = arith.constant 0 : i32
    return %c0_i32, %c0_i32_0 : i32, i32
  }
  func.func @transform_7(%arg0: i32) -> (i32, i32) {
    %c0_i32 = arith.constant 0 : i32
    %c0_i32_0 = arith.constant 0 : i32
    return %arg0, %c0_i32 : i32, i32
  }
}

</mosaic_0001>

<bundles_post_ra>
// kernel: discriminator_forward.1
= control target key start
LH: loop header
LB: loop body
LE: loop exit
PB: predicated region body
PF: predicated region fallthrough
CT: control target
= control target key end

     0   :  { %s5029_s0 = inlined_call_operand.hbm [shape: f32[64,784], index: 0, kind: input, shape index: {}]   ;;  %s5030_s1 = inlined_call_operand.hbm [shape: bf16[784,512], index: 1, kind: input, shape index: {}]   ;;  %s5031_s2 = inlined_call_operand.hbm [shape: f32[1,512], index: 2, kind: input, shape index: {}]   ;;  %s5032_s3 = inlined_call_operand.hbm [shape: bf16[512,256], index: 3, kind: input, shape index: {}]   ;;  %s5033_s4 = inlined_call_operand.vmem [shape: f32[1,256], index: 4, kind: input, shape index: {}]   ;;  %s5034_s5 = inlined_call_operand.vmem [shape: f32[1,256], index: 5, kind: input, shape index: {}]   ;;  %s5035_s6 = inlined_call_operand.<no memory space> [shape: f32[1,1], index: 6, kind: input, shape index: {}]   ;;  %s5036_s7 = inlined_call_operand.vmem [shape: f32[64,1], index: 7, kind: output, shape index: {}]  }
   0x1   :  { %v12_v0 = vstv %s5035_s6 }
   0x2   :  { %13 = vst [vmem:[#allocation2] sm:$0x1] %v12_v0 }
   0x3   :  { %14 = vsyncpa [#allocation4], 0 }
   0x4   :  { %16 = vsyncpa [#allocation4 + $0x1], 0 }
   0x5   :  { %17 = vsyncpa [#allocation6], 0 }
   0x6   :  { %18 = vsyncpa [#allocation9], 0  ;;  %s4574_s26 = smov 0   ;;  %s4576_s27 = smov 0  }
   0x7   :  { %s4578_s28 = smov 0   ;;  %s4580_s29 = smov 0  }
   0x8 LB: > { %s2931_s6 = sadd.s32 4294967295, %s4520_s29   ;;  %p44_p0 = scmp.ne.s32.totalorder %s4512_s27, %s4508_s26  ;;  %s4520_s29 = sphi %s4580_s29, %s5045_s29   ;;  %s4516_s28 = sphi %s4578_s28, %s5044_s28   ;;  %s4512_s27 = sphi %s4576_s27, %s5043_s27   ;;  %s4508_s26 = sphi %s4574_s26, %s5042_s26  }
   0x9   : > { %p4596_p1 = scmp.eq.s32.totalorder %s2931_s6, 0  ;;  %p2933_p2 = scmp.ge.s32.totalorder %s4520_s29, 1 }
   0xa   : > { %p207_p3 = scmp.lt.s32.totalorder %s4520_s29, 3  ;;  %s218_s11 = sshll.u32 %s5030_s1, 4  ;;  %s219_s11 = int_to_ptr.hbm [resolvable:$true] %s218_s11 }
   0xb   : > { %p4604_p4 = por %p4596_p1, %p44_p0  ;;  %s4522_s13 = smov [#allocation5]  }
   0xc   : > { %p4611_p5 = pnand %p2933_p2, %p207_p3  ;;  %s220_s14 = sshll.u32 %s4522_s13, 4  ;;  %s221_s14 = int_to_ptr.vmem [resolvable:$true] %s220_s14 }
   0xd   : > { %s233_s18 = sshll.u32 %s5031_s2, 4  ;;  %s4523_s19 = smov 256   ;;  %s234_s18 = int_to_ptr.hbm [resolvable:$true] %s233_s18 }
   0xe   : > { %p4278_p6 = pneg %p4611_p5  ;;  %s4524_s20 = smov 16  }
   0xf   : > { %s4525_s21 = smov [#allocation7]   ;;  %s244_s25 = sshll.u32 %s5032_s3, 4  ;;  %s245_s25 = int_to_ptr.hbm [resolvable:$true] %s244_s25 }
  0x10   : > { %p4619_p7 = pnand %p4278_p6, %p4596_p1  ;;  %s235_s22 = sshll.u32 %s4525_s21, 4  ;;  %s236_s22 = int_to_ptr.vmem [resolvable:$true] %s235_s22 }
  0x11   : > { %s4526_s26 = smov [#allocation8]   ;;  %s4527_s10 = smov 128  }
  0x12   : > { %4281 = dma.hbm_to_vmem [thread:$0]  (!%p4619_p7), %s219_s11, 25088, %s221_s14, [#allocation6], %s4523_s19, %s4523_s19, %s4524_s20  }
  0x13   : > { %4284 = dma.hbm_to_vmem [thread:$0]  (!%p4619_p7), %s234_s18, 64, %s236_s22, [#allocation6]  }
  0x14   : > { %s246_s9 = sshll.u32 %s4526_s26, 4  ;;  %s4528_s11 = smov 8   ;;  %s247_s9 = int_to_ptr.vmem [resolvable:$true] %s246_s9 }
  0x15   : > { %4287 = dma.hbm_to_vmem [thread:$0]  (!%p4619_p7), %s245_s25, 8192, %s247_s9, [#allocation9], %s4527_s10, %s4527_s10, %s4528_s11  }
  0x16   : > { %s4636_s13 = sadd.s32 1, %s4520_s29   ;;  %s31_s16 = sadd.s32 1, %s4516_s28 }
  0x17   : > { %s28_s14 = ssub.s32 %s4520_s29, %s4636_s13  ;;  %p38_p9 = scmp.ne.s32.totalorder %s4516_s28, %s4512_s27 }
  0x18   : > { %p29_p8 = scmp.eq.s32.totalorder %s28_s14, 0  ;;  %p39_p10 = scmp.eq.s32.totalorder %s4520_s29, 0 }
  0x19   : > { %p4295_p11 = scmp.lt.s32.totalorder %s4520_s29, 2  ;;  %s269_s18 = sand.u32 1, %s4516_s28  }
  0x1a   : > { %s4646_s17 = scalar_select %p29_p8, %s4516_s28, %s31_s16  }
  0x1b   : > { %p40_p12 = por %p39_p10, %p38_p9  ;;  %s4261_s19 = smul.u32 224, %s269_s18 }
  0x1c   : > { %s4262_s20 = smul.u32 224, %s4520_s29  ;;  %s270_s9 = scalar_lea.sflag [#allocation4], %s269_s18 }
  0x1d   : > { %p4650_p13 = pnand %p4295_p11, %p40_p12  ;;  %s273_s24 = scalar_lea.vmem [#allocation3], %s4261_s19 }
  0x1e   : > { %s279_s23 = scalar_lea.hbm %s5029_s0, %s4262_s20  ;;  %s282_s25 = sshll.u32 %s273_s24, 4  ;;  %s283_s25 = int_to_ptr.vmem [resolvable:$true] %s282_s25 }
  0x1f   : > { %s280_s26 = sshll.u32 %s279_s23, 4  ;;  %p4452_p2 = pneg %p4650_p13  ;;  %s281_s26 = int_to_ptr.hbm [resolvable:$true] %s280_s26 }
  0x20   : > { %s4448_s10 = sshra.s32 %s281_s26, 4  ;;  %s4455_s15 = scalar_lea.hbm %s5029_s0, 448  ;;  %s4449_s10 = int_to_ptr.hbm [resolvable:$true] %s4448_s10 }
  0x21   : > { %s4450_s11 = scalar_lea.hbm %s4449_s10, 224  ;;  %p4456_p7 = scmp.lt.s32.totalorder %s4449_s10, %s5029_s0 }
  0x22   : > { %p4451_p0 = scmp.ne.s32.totalorder %s4449_s10, %s4450_s11  ;;  %p4457_p8 = scmp.lt.s32.totalorder %s4455_s15, %s4450_s11 }
  0x24   : > { %p4453_p3 = pnand %p4452_p2, %p4451_p0  ;;  %p4458_p9 = por %p4457_p8, %p4456_p7 }
  0x26   : > { %p4454_p6 = pneg %p4453_p3 }
  0x28   : > { %p4459_p10 = pnand %p4458_p9, %p4454_p6 }
  0x2a   : > { %4462 = shalt.err (!%p4459_p10)
}
  0x2b   : > { %s4529_s18 = smov 896   ;;  %s4530_s19 = smov 56  }
  0x2c   : > { %4291 = dma.hbm_to_vmem [thread:$0]  (!%p4650_p13), %s281_s26, 3584, %s283_s25, %s270_s9, %s4529_s18, %s4529_s18, %s4530_s19  }
  0x2d   : > { %294 = sbr.rel (%p4611_p5) target bundleno = 781 (0x30d), region = 48  ;;  %s296_s23 = sand.u32 (!%p4611_p5), 1, %s4512_s27  }
  0x2e   : > { %s4263_s24 = smul.u32 (!%p4611_p5), 224, %s296_s23  ;;  %s297_s14 = scalar_lea.sflag (!%p4611_p5), [#allocation4], %s296_s23 }
  0x30   : > { %s4670_s16 = scalar_lea.vmem (!%p4611_p5), [#allocation3], %s4263_s24 }
  0x32   : > { %4495 = dma.done.wait (%p4604_p4), %s297_s14, 3584  }
  0x33   : > { %4497 = vsyncadd (%p4604_p4), %s297_s14, 4294963712 }
  0x34   : > { %4499 = dma.done.wait (%p4596_p1), [#allocation6], 25152  }
  0x35   : > { %4501 = vsyncadd (%p4596_p1), [#allocation6], 4294942144 }
  0x36   : > { %4503 = dma.done.wait (%p4596_p1), [#allocation9], 8192  }
  0x37   : > { %4505 = vsyncadd (%p4596_p1), [#allocation9], 4294959104  ;;  %v3061_v1 = vld [vmem:[#allocation5 + $0xe0] sm:$0xf]  ;;  %v4031_v2 = vld [vmem:[#allocation5 + $0xec] sm:$0xf0] }
  0x38   : > { %v3189_v3 = vld [vmem:[#allocation5 + $0x1e0] sm:$0xf]  ;;  %v3062_v4 = vor.u32 %v4031_v2, %v3061_v1  ;;  %v4063_v5 = vld [vmem:[#allocation5 + $0x1ec] sm:$0xf0]  ;;  %vm1583_vm0 = vcmask 130048   ;;  %s2945_s25 = sshll.u32 %s2931_s6, 2 }
  0x39   : > { %v3317_v6 = vld [vmem:[#allocation5 + $0x2e0] sm:$0xf]  ;;  %v4095_v7 = vld [vmem:[#allocation5 + $0x2ec] sm:$0xf0]  ;;  %v3190_v8 = vor.u32 %v4063_v5, %v3189_v3  ;;  %p349_p1 = scmp.lt.s32.totalorder %s2945_s25, 7  ;;  %vm2830_vm3 = vcmask 7168  }
  0x3a   : > { %v3318_v9 = vor.u32 %v4095_v7, %v3317_v6  ;;  %v3445_v10 = vld [vmem:[#allocation5 + $0x3e0] sm:$0xf]  ;;  %v4127_v11 = vld [vmem:[#allocation5 + $0x3ec] sm:$0xf0]  ;;  %1590 = vmatpush.bf16.msra.mxu0 %v3062_v4 }
  0x3b   : > { %v3045_v12 = vld [vmem:[#allocation5 + $0xc0] sm:$0xf]  ;;  %v3446_v13 = vor.u32 %v4127_v11, %v3445_v10  ;;  %v4027_v14 = vld [vmem:[#allocation5 + $0xcc] sm:$0xf0]  ;;  %1609 = vmatpush.bf16.msra.mxu1 %v3190_v8  ;;  %s5047_s25 = smov (!%p349_p1, %s2945_s25), 7 }
  0x3c   : > { %v3173_v15 = vld [vmem:[#allocation5 + $0x1c0] sm:$0xf]  ;;  %v4059_v16 = vld [vmem:[#allocation5 + $0x1cc] sm:$0xf0]  ;;  %1628 = vmatpush.bf16.msra.mxu2 %v3318_v9  ;;  %v3046_v17 = vor.u32 %v4027_v14, %v3045_v12  ;;  %s2946_s26 = sshll.u32 %s5047_s25, 3 }
  0x3d   : > { %v3174_v18 = vor.u32 %v4059_v16, %v3173_v15  ;;  %v3301_v19 = vld [vmem:[#allocation5 + $0x2c0] sm:$0xf]  ;;  %v4091_v20 = vld [vmem:[#allocation5 + $0x2cc] sm:$0xf0]  ;;  %1647 = vmatpush.bf16.msra.mxu3 %v3446_v13  ;;  %s5006_s9 = scalar_lea.vmem %s5036_s7, %s2946_s26 }
  0x3e   : > { %v3429_v21 = vld [vmem:[#allocation5 + $0x3c0] sm:$0xf]  ;;  %v3302_v22 = vor.u32 %v4091_v20, %v3301_v19  ;;  %v4123_v23 = vld [vmem:[#allocation5 + $0x3cc] sm:$0xf0]  ;;  %1591 = vmatpush.bf16.msra.mxu0 %v3046_v17 }
  0x3f   : > { %v3029_v24 = vld [vmem:[#allocation5 + $0xa0] sm:$0xf]  ;;  %v4023_v25 = vld [vmem:[#allocation5 + $0xac] sm:$0xf0]  ;;  %v3430_v26 = vor.u32 %v4123_v23, %v3429_v21  ;;  %1610 = vmatpush.bf16.msra.mxu1 %v3174_v18 }
  0x40   : > { %v3157_v27 = vld [vmem:[#allocation5 + $0x1a0] sm:$0xf]  ;;  %v4055_v28 = vld [vmem:[#allocation5 + $0x1ac] sm:$0xf0]  ;;  %v3030_v30 = vor.u32 %v4023_v25, %v3029_v24  ;;  %1629 = vmatpush.bf16.msra.mxu2 %v3302_v22 }
  0x41   : > { %v3285_v29 = vld [vmem:[#allocation5 + $0x2a0] sm:$0xf]  ;;  %v4087_v31 = vld [vmem:[#allocation5 + $0x2ac] sm:$0xf0]  ;;  %v3158_v34 = vor.u32 %v4055_v28, %v3157_v27  ;;  %1648 = vmatpush.bf16.msra.mxu3 %v3430_v26 }
  0x42   : > { %v3413_v32 = vld [vmem:[#allocation5 + $0x3a0] sm:$0xf]  ;;  %v4119_v33 = vld [vmem:[#allocation5 + $0x3ac] sm:$0xf0]  ;;  %v3286_v35 = vor.u32 %v4087_v31, %v3285_v29  ;;  %1592 = vmatpush.bf16.msra.mxu0 %v3030_v30  ;;  %v362_v30 = vld [vmem:[%s4670_s16 + $0x38] sm:$0xff] }
  0x43   : > { %v3013_v36 = vld [vmem:[#allocation5 + $0x80] sm:$0xf]  ;;  %v4019_v37 = vld [vmem:[#allocation5 + $0x8c] sm:$0xf0]  ;;  %v3414_v39 = vor.u32 %v4119_v33, %v3413_v32  ;;  %1611 = vmatpush.bf16.msra.mxu1 %v3158_v34  ;;  %v356_v31 = vld [vmem:[%s4670_s16 + $0x8] sm:$0xff] }
  0x44   : > { %v3141_v38 = vld [vmem:[#allocation5 + $0x180] sm:$0xf]  ;;  %v4051_v40 = vld [vmem:[#allocation5 + $0x18c] sm:$0xf0]  ;;  %v3014_v45 = vor.u32 %v4019_v37, %v3013_v36  ;;  %1630 = vmatpush.bf16.msra.mxu2 %v3286_v35 }
  0x45   : > { %v3269_v41 = vld [vmem:[#allocation5 + $0x280] sm:$0xf]  ;;  %v4083_v42 = vld [vmem:[#allocation5 + $0x28c] sm:$0xf0]  ;;  %v3142_v46 = vor.u32 %v4051_v40, %v3141_v38  ;;  %1649 = vmatpush.bf16.msra.mxu3 %v3414_v39 }
  0x46   : > { %v3397_v43 = vld [vmem:[#allocation5 + $0x380] sm:$0xf]  ;;  %v4115_v44 = vld [vmem:[#allocation5 + $0x38c] sm:$0xf0]  ;;  %v3270_v47 = vor.u32 %v4083_v42, %v3269_v41  ;;  %1593 = vmatpush.bf16.msra.mxu0 %v3014_v45  ;;  %v364_v41 = vld [vmem:[%s4670_s16 + $0x48] sm:$0xff] }
  0x47   : > { %v2997_v48 = vld [vmem:[#allocation5 + $0x60] sm:$0xf]  ;;  %v4015_v49 = vld [vmem:[#allocation5 + $0x6c] sm:$0xf0]  ;;  %v3398_v51 = vor.u32 %v4115_v44, %v3397_v43  ;;  %1612 = vmatpush.bf16.msra.mxu1 %v3142_v46  ;;  %v358_v42 = vld [vmem:[%s4670_s16 + $0x18] sm:$0xff] }
  0x48   : > { %v3125_v50 = vld [vmem:[#allocation5 + $0x160] sm:$0xf]  ;;  %v4047_v52 = vld [vmem:[#allocation5 + $0x16c] sm:$0xf0]  ;;  %v2998_v57 = vor.u32 %v4015_v49, %v2997_v48  ;;  %1631 = vmatpush.bf16.msra.mxu2 %v3270_v47 }
  0x49   : > { %v3253_v53 = vld [vmem:[#allocation5 + $0x260] sm:$0xf]  ;;  %v4079_v54 = vld [vmem:[#allocation5 + $0x26c] sm:$0xf0]  ;;  %v3126_v58 = vor.u32 %v4047_v52, %v3125_v50  ;;  %1650 = vmatpush.bf16.msra.mxu3 %v3398_v51  ;;  %v4029_v50 = vld [vmem:[#allocation5 + $0xe4] sm:$0xf] }
  0x4a   : > { %v3381_v55 = vld [vmem:[#allocation5 + $0x360] sm:$0xf]  ;;  %v4111_v56 = vld [vmem:[#allocation5 + $0x36c] sm:$0xf0]  ;;  %v3254_v59 = vor.u32 %v4079_v54, %v3253_v53  ;;  %1594 = vmatpush.bf16.msra.mxu0 %v2998_v57  ;;  %v3063_v51 = vld [vmem:[#allocation5 + $0xf0] sm:$0xf0] }
  0x4b   : > { %v2981_v60 = vld [vmem:[#allocation5 + $0x40] sm:$0xf]  ;;  %v4011_v61 = vld [vmem:[#allocation5 + $0x4c] sm:$0xf0]  ;;  %v3382_v63 = vor.u32 %v4111_v56, %v3381_v55  ;;  %1613 = vmatpush.bf16.msra.mxu1 %v3126_v58  ;;  %v3066_v58 = vor.u32 %v4029_v50, %v3063_v51 }
  0x4c   : > { %v3109_v62 = vld [vmem:[#allocation5 + $0x140] sm:$0xf]  ;;  %v4043_v0 = vld [vmem:[#allocation5 + $0x14c] sm:$0xf0]  ;;  %v2982_v5 = vor.u32 %v4011_v61, %v2981_v60  ;;  %1632 = vmatpush.bf16.msra.mxu2 %v3254_v59 }
  0x4d   : > { %v3237_v1 = vld [vmem:[#allocation5 + $0x240] sm:$0xf]  ;;  %v4075_v2 = vld [vmem:[#allocation5 + $0x24c] sm:$0xf0]  ;;  %v3110_v6 = vor.u32 %v4043_v0, %v3109_v62  ;;  %1651 = vmatpush.bf16.msra.mxu3 %v3382_v63  ;;  %v4025_v62 = vld [vmem:[#allocation5 + $0xc4] sm:$0xf] }
  0x4e   : > { %v3365_v3 = vld [vmem:[#allocation5 + $0x340] sm:$0xf]  ;;  %v4107_v4 = vld [vmem:[#allocation5 + $0x34c] sm:$0xf0]  ;;  %v3238_v7 = vor.u32 %v4075_v2, %v3237_v1  ;;  %1595 = vmatpush.bf16.msra.mxu0 %v2982_v5  ;;  %v3047_v63 = vld [vmem:[#allocation5 + $0xd0] sm:$0xf0] }
  0x4f   : > { %v2965_v8 = vld [vmem:[#allocation5 + $0x20] sm:$0xf]  ;;  %v4007_v9 = vld [vmem:[#allocation5 + $0x2c] sm:$0xf0]  ;;  %v3366_v11 = vor.u32 %v4107_v4, %v3365_v3  ;;  %1614 = vmatpush.bf16.msra.mxu1 %v3110_v6  ;;  %v3050_v3 = vor.u32 %v4025_v62, %v3047_v63 }
  0x50   : > { %v3093_v10 = vld [vmem:[#allocation5 + $0x120] sm:$0xf]  ;;  %v4039_v12 = vld [vmem:[#allocation5 + $0x12c] sm:$0xf0]  ;;  %v2966_v18 = vor.u32 %v4007_v9, %v2965_v8  ;;  %1633 = vmatpush.bf16.msra.mxu2 %v3238_v7  ;;  %v4021_v7 = vld [vmem:[#allocation5 + $0xa4] sm:$0xf] }
  0x51   : > { %v3221_v13 = vld [vmem:[#allocation5 + $0x220] sm:$0xf]  ;;  %v4071_v14 = vld [vmem:[#allocation5 + $0x22c] sm:$0xf0]  ;;  %v3094_v22 = vor.u32 %v4039_v12, %v3093_v10  ;;  %1652 = vmatpush.bf16.msra.mxu3 %v3366_v11  ;;  %v3031_v8 = vld [vmem:[#allocation5 + $0xb0] sm:$0xf0] }
  0x52   : > { %v3349_v15 = vld [vmem:[#allocation5 + $0x320] sm:$0xf]  ;;  %v4103_v16 = vld [vmem:[#allocation5 + $0x32c] sm:$0xf0]  ;;  %v3222_v23 = vor.u32 %v4071_v14, %v3221_v13  ;;  %1596 = vmatpush.bf16.msra.mxu0 %v2966_v18  ;;  %v4017_v14 = vld [vmem:[#allocation5 + $0x84] sm:$0xf] }
  0x53   : > { %v2949_v17 = vld [vmem:[#allocation5] sm:$0xf]  ;;  %v4003_v19 = vld [vmem:[#allocation5 + $0xc] sm:$0xf0]  ;;  %v3350_v27 = vor.u32 %v4103_v16, %v3349_v15  ;;  %1615 = vmatpush.bf16.msra.mxu1 %v3094_v22  ;;  %v3034_v15 = vor.u32 %v4021_v7, %v3031_v8  ;;  %v3015_v16 = vld [vmem:[#allocation5 + $0x90] sm:$0xf0] }
  0x54   : > { %v3077_v20 = vld [vmem:[#allocation5 + $0x100] sm:$0xf]  ;;  %v4035_v21 = vld [vmem:[#allocation5 + $0x10c] sm:$0xf0]  ;;  %v2950_v34 = vor.u32 %v4003_v19, %v2949_v17  ;;  %1634 = vmatpush.bf16.msra.mxu2 %v3222_v23  ;;  %v376_v18 = vld [vmem:[%s4670_s16 + $0xa8] sm:$0xff] }
  0x55   : > { %v3205_v24 = vld [vmem:[#allocation5 + $0x200] sm:$0xf]  ;;  %v4067_v25 = vld [vmem:[#allocation5 + $0x20c] sm:$0xf0]  ;;  %v3078_v38 = vor.u32 %v4035_v21, %v3077_v20  ;;  %1653 = vmatpush.bf16.msra.mxu3 %v3350_v27  ;;  %v370_v20 = vld [vmem:[%s4670_s16 + $0x78] sm:$0xff] }
  0x56   : > { %v3333_v26 = vld [vmem:[#allocation5 + $0x300] sm:$0xf]  ;;  %v4099_v28 = vld [vmem:[#allocation5 + $0x30c] sm:$0xf0]  ;;  %v3206_v39 = vor.u32 %v4067_v25, %v3205_v24  ;;  %1597 = vmatpush.bf16.msra.mxu0 %v2950_v34  ;;  %v378_v23 = vld [vmem:[%s4670_s16 + $0xb8] sm:$0xff] }
  0x57   : > { %v355_v29 = vld [vmem:[%s4670_s16] sm:$0xff]  ;;  %v4195_v33 = vld [vmem:[#allocation5 + $0x60c] sm:$0xf0]  ;;  %v3334_v43 = vor.u32 %v4099_v28, %v3333_v26  ;;  %1616 = vmatpush.bf16.msra.mxu1 %v3078_v38  ;;  %v372_v27 = vld [vmem:[%s4670_s16 + $0x88] sm:$0xff] }
  0x58   : > { %v3717_v32 = vld [vmem:[#allocation5 + $0x600] sm:$0xf]  ;;  %v4191_v37 = vld [vmem:[#allocation5 + $0x5ec] sm:$0xf0]  ;;  %v4692_v48 = vpack.c.bf16 %v362_v30, %v355_v29  ;;  %1635 = vmatpush.bf16.msra.mxu2 %v3206_v39  ;;  %v3018_v30 = vor.u32 %v4017_v14, %v3015_v16  ;;  %v3399_v7 = vld [vmem:[#allocation5 + $0x390] sm:$0xf0] }
  0x59   : > { %v363_v35 = vld [vmem:[%s4670_s16 + $0x40] sm:$0xff]  ;;  %v357_v40 = vld [vmem:[%s4670_s16 + $0x10] sm:$0xff]  ;;  %v3718_v45 = vor.u32 %v4195_v33, %v3717_v32  ;;  %1654 = vmatpush.bf16.msra.mxu3 %v3334_v43 }
  0x5a   : > { %v3701_v36 = vld [vmem:[#allocation5 + $0x5e0] sm:$0xf]  ;;  %v365_v44 = vld [vmem:[%s4670_s16 + $0x50] sm:$0xff]  ;;  %v4694_v52 = vpack.c.bf16 %v363_v35, %v356_v31  ;;  %v4696_v53 = vpack.c.bf16 %v364_v41, %v357_v40  ;;  %1598 = vmatmul.bf16.vlgmr.msra.gmra.mxu0 %v4692_v48  ;;  %v4125_v32 = vld [vmem:[#allocation5 + $0x3e4] sm:$0xf] }
  0x5b   : > { %v3573_v46 = vld [vmem:[#allocation5 + $0x4e0] sm:$0xf]  ;;  %v4159_v47 = vld [vmem:[#allocation5 + $0x4ec] sm:$0xf0]  ;;  %v3702_v49 = vor.u32 %v4191_v37, %v3701_v36  ;;  %v4698_v56 = vpack.c.bf16 %v365_v44, %v358_v42  ;;  %v3447_v33 = vld [vmem:[#allocation5 + $0x3f0] sm:$0xf0] }
  0x5c   : > { %v3685_v54 = vld [vmem:[#allocation5 + $0x5c0] sm:$0xf]  ;;  %v4187_v55 = vld [vmem:[#allocation5 + $0x5cc] sm:$0xf0]  ;;  %v3574_v57 = vor.u32 %v4159_v47, %v3573_v46  ;;  %1711 = vmatpush.bf16.msrb.mxu2 %v3718_v45  ;;  %1617 = vmatmul.bf16.vlgmr.msra.gmra.mxu1 %v4694_v52  ;;  %v4013_v36 = vld [vmem:[#allocation5 + $0x64] sm:$0xf]  ;;  %v3450_v38 = vor.u32 %v4125_v32, %v3447_v33 }
  0x5d   : > { %v3557_v59 = vld [vmem:[#allocation5 + $0x4c0] sm:$0xf]  ;;  %v4155_v60 = vld [vmem:[#allocation5 + $0x4cc] sm:$0xf0]  ;;  %1685 = vmatpush.bf16.msrb.mxu1 %v3702_v49  ;;  %v3686_v61 = vor.u32 %v4187_v55, %v3685_v54  ;;  %1636 = vmatmul.bf16.vlgmr.msra.gmra.mxu2 %v4696_v53  ;;  %v2999_v37 = vld [vmem:[#allocation5 + $0x70] sm:$0xf0] }
  0x5e   : > { %v3669_v0 = vld [vmem:[#allocation5 + $0x5a0] sm:$0xf]  ;;  %v4183_v1 = vld [vmem:[#allocation5 + $0x5ac] sm:$0xf0]  ;;  %1655 = vmatmul.bf16.vlgmr.msra.gmra.mxu3 %v4698_v56  ;;  %1666 = vmatpush.bf16.msrb.mxu0 %v3574_v57  ;;  %v3558_v2 = vor.u32 %v4155_v60, %v3557_v59  ;;  %v4121_v45 = vld [vmem:[#allocation5 + $0x3c4] sm:$0xf]  ;;  %v3002_v47 = vor.u32 %v4013_v36, %v2999_v37 }
  0x5f   : > { %1723 = vmatpush.bf16.msrb.mxu3 %v3066_v58  ;;  %v3541_v4 = vld [vmem:[#allocation5 + $0x4a0] sm:$0xf]  ;;  %v4151_v5 = vld [vmem:[#allocation5 + $0x4ac] sm:$0xf0]  ;;  %v3670_v6 = vor.u32 %v4183_v1, %v3669_v0  ;;  %v3431_v46 = vld [vmem:[#allocation5 + $0x3d0] sm:$0xf0] }
  0x60   : > { %v3653_v9 = vld [vmem:[#allocation5 + $0x580] sm:$0xf]  ;;  %v4179_v10 = vld [vmem:[#allocation5 + $0x58c] sm:$0xf0]  ;;  %v3542_v11 = vor.u32 %v4151_v5, %v3541_v4  ;;  %1780 = vmatpush.bf16.msra.mxu2 %v3450_v38  ;;  %v3434_v51 = vor.u32 %v4121_v45, %v3431_v46  ;;  %v4009_v55 = vld [vmem:[#allocation5 + $0x44] sm:$0xf] }
  0x61   : > { %1686 = vmatpush.bf16.msrb.mxu1 %v3686_v61  ;;  %v3525_v12 = vld [vmem:[#allocation5 + $0x480] sm:$0xf]  ;;  %v4147_v13 = vld [vmem:[#allocation5 + $0x48c] sm:$0xf0]  ;;  %v3654_v19 = vor.u32 %v4179_v10, %v3653_v9  ;;  %v2983_v57 = vld [vmem:[#allocation5 + $0x50] sm:$0xf0] }
  0x62   : > { %1667 = vmatpush.bf16.msrb.mxu0 %v3558_v2  ;;  %v369_v17 = vld [vmem:[%s4670_s16 + $0x70] sm:$0xff]  ;;  %v371_v22 = vld [vmem:[%s4670_s16 + $0x80] sm:$0xff]  ;;  %v3526_v26 = vor.u32 %v4147_v13, %v3525_v12  ;;  %v2986_v63 = vor.u32 %v4009_v55, %v2983_v57 }
  0x63   : > { %1724 = vmatpush.bf16.msrb.mxu3 %v3050_v3  ;;  %v377_v21 = vld [vmem:[%s4670_s16 + $0xb0] sm:$0xff]  ;;  %v3637_v24 = vld [vmem:[#allocation5 + $0x560] sm:$0xf]  ;;  %v4712_v34 = vpack.c.bf16 %v376_v18, %v369_v17  ;;  %v4716_v40 = vpack.c.bf16 %v378_v23, %v371_v22  ;;  %v4117_v58 = vld [vmem:[#allocation5 + $0x3a4] sm:$0xf] }
  0x64   : > { %v4175_v25 = vld [vmem:[#allocation5 + $0x56c] sm:$0xf0]  ;;  %v379_v28 = vld [vmem:[%s4670_s16 + $0xc0] sm:$0xff]  ;;  %v4714_v39 = vpack.c.bf16 %v377_v21, %v370_v20  ;;  %v3415_v61 = vld [vmem:[#allocation5 + $0x3b0] sm:$0xf0]  ;;  %1781 = vmatpush.bf16.msra.mxu2 %v3434_v51 }
  0x65   : > { %1687 = vmatpush.bf16.msrb.mxu1 %v3670_v6  ;;  %v3509_v29 = vld [vmem:[#allocation5 + $0x460] sm:$0xf]  ;;  %v4143_v31 = vld [vmem:[#allocation5 + $0x46c] sm:$0xf0]  ;;  %v3638_v35 = vor.u32 %v4175_v25, %v3637_v24  ;;  %v4718_v43 = vpack.c.bf16 %v379_v28, %v372_v27  ;;  %v4005_v2 = vld [vmem:[#allocation5 + $0x24] sm:$0xf]  ;;  %v3418_v3 = vor.u32 %v4117_v58, %v3415_v61 }
  0x66   : > { %1668 = vmatpush.bf16.msrb.mxu0 %v3542_v11  ;;  %v3621_v41 = vld [vmem:[#allocation5 + $0x540] sm:$0xf]  ;;  %v4171_v42 = vld [vmem:[#allocation5 + $0x54c] sm:$0xf0]  ;;  %v3510_v44 = vor.u32 %v4143_v31, %v3509_v29  ;;  %v2967_v5 = vld [vmem:[#allocation5 + $0x30] sm:$0xf0] }
  0x67   : > { %1725 = vmatpush.bf16.msrb.mxu3 %v3034_v15  ;;  %v3493_v49 = vld [vmem:[#allocation5 + $0x440] sm:$0xf]  ;;  %v4139_v50 = vld [vmem:[#allocation5 + $0x44c] sm:$0xf0]  ;;  %v3622_v54 = vor.u32 %v4171_v42, %v3621_v41  ;;  %v4113_v6 = vld [vmem:[#allocation5 + $0x384] sm:$0xf]  ;;  %v2970_v14 = vor.u32 %v4005_v2, %v2967_v5 }
  0x68   : > { %v3605_v59 = vld [vmem:[#allocation5 + $0x520] sm:$0xf]  ;;  %v4167_v60 = vld [vmem:[#allocation5 + $0x52c] sm:$0xf0]  ;;  %v3494_v62 = vor.u32 %v4139_v50, %v3493_v49  ;;  %v4093_v12 = vld [vmem:[#allocation5 + $0x2e4] sm:$0xf]  ;;  %1782 = vmatpush.bf16.msra.mxu2 %v3418_v3  ;;  %v3402_v18 = vor.u32 %v4113_v6, %v3399_v7 }
  0x69   : > { %1688 = vmatpush.bf16.msrb.mxu1 %v3654_v19  ;;  %v3477_v0 = vld [vmem:[#allocation5 + $0x420] sm:$0xf]  ;;  %v4135_v1 = vld [vmem:[#allocation5 + $0x42c] sm:$0xf0]  ;;  %v3606_v4 = vor.u32 %v4167_v60, %v3605_v59  ;;  %v3319_v13 = vld [vmem:[#allocation5 + $0x2f0] sm:$0xf0] }
  0x6a   : > { %1669 = vmatpush.bf16.msrb.mxu0 %v3526_v26  ;;  %v3589_v8 = vld [vmem:[#allocation5 + $0x500] sm:$0xf]  ;;  %v4163_v9 = vld [vmem:[#allocation5 + $0x50c] sm:$0xf0]  ;;  %v3478_v10 = vor.u32 %v4135_v1, %v3477_v0  ;;  %v4001_v16 = vld [vmem:[#allocation5 + $0x4] sm:$0xf]  ;;  %v3322_v25 = vor.u32 %v4093_v12, %v3319_v13 }
  0x6b   : > { %1726 = vmatpush.bf16.msrb.mxu3 %v3018_v30  ;;  %1603 = vmatmul.bf16.gmra.mxu0 %v4712_v34  ;;  %v3461_v11 = vld [vmem:[#allocation5 + $0x400] sm:$0xf]  ;;  %v4131_v15 = vld [vmem:[#allocation5 + $0x40c] sm:$0xf0]  ;;  %v2951_v17 = vld [vmem:[#allocation5 + $0x10] sm:$0xf0]  ;;  %v3590_v19 = vor.u32 %v4163_v9, %v3589_v8 }
  0x6c   : > { %1622 = vmatmul.bf16.gmra.mxu1 %v4714_v39  ;;  %v359_v20 = vld [vmem:[%s4670_s16 + $0x20] sm:$0xff]  ;;  %v366_v21 = vld [vmem:[%s4670_s16 + $0x58] sm:$0xff]  ;;  %v3191_v23 = vld [vmem:[#allocation5 + $0x1f0] sm:$0xf0]  ;;  %v3462_v29 = vor.u32 %v4131_v15, %v3461_v11  ;;  %v2954_v33 = vor.u32 %v4001_v16, %v2951_v17  ;;  %1783 = vmatpush.bf16.msra.mxu2 %v3402_v18 }
  0x6d   : > { %1689 = vmatpush.bf16.msrb.mxu1 %v3638_v35  ;;  %1641 = vmatmul.bf16.gmra.mxu2 %v4716_v40  ;;  %v4061_v22 = vld [vmem:[#allocation5 + $0x1e4] sm:$0xf]  ;;  %v3575_v26 = vld [vmem:[#allocation5 + $0x4f0] sm:$0xf0]  ;;  %v360_v30 = vld [vmem:[%s4670_s16 + $0x28] sm:$0xff] }
  0x6e   : > { %1660 = vmatmul.bf16.gmra.mxu3 %v4718_v43  ;;  %1670 = vmatpush.bf16.msrb.mxu0 %v3510_v44  ;;  %v4157_v24 = vld [vmem:[#allocation5 + $0x4e4] sm:$0xf]  ;;  %v3383_v28 = vld [vmem:[#allocation5 + $0x370] sm:$0xf0]  ;;  %v368_v35 = vld [vmem:[%s4670_s16 + $0x68] sm:$0xff]  ;;  %v3194_v36 = vor.u32 %v4061_v22, %v3191_v23 }
  0x6f   : > { %1727 = vmatpush.bf16.msrb.mxu3 %v3002_v47  ;;  %v4109_v27 = vld [vmem:[#allocation5 + $0x364] sm:$0xf]  ;;  %v361_v32 = vld [vmem:[%s4670_s16 + $0x30] sm:$0xff]  ;;  %v3578_v41 = vor.u32 %v4157_v24, %v3575_v26  ;;  %v4730_v47 = vpack.c.bf16 %v366_v21, %v359_v20  ;;  %v3069_v17 = vld [vmem:[#allocation5 + $0xe8] sm:$0xf] }
  0x70   : > { %v367_v31 = vld [vmem:[%s4670_s16 + $0x60] sm:$0xff]  ;;  %v3175_v38 = vld [vmem:[#allocation5 + $0x1d0] sm:$0xf0]  ;;  %v3386_v46 = vor.u32 %v4109_v27, %v3383_v28  ;;  %v4734_v55 = vpack.c.bf16 %v368_v35, %v361_v32  ;;  %v4032_v18 = vld [vmem:[#allocation5 + $0xf4] sm:$0xf0] }
  0x71   : > { %1690 = vmatpush.bf16.msrb.mxu1 %v3622_v54  ;;  %v4057_v37 = vld [vmem:[#allocation5 + $0x1c4] sm:$0xf]  ;;  %v3303_v44 = vld [vmem:[#allocation5 + $0x2d0] sm:$0xf0]  ;;  %v4732_v49 = vpack.c.bf16 %v367_v31, %v360_v30  ;;  %v380_v24 = vld [vmem:[%s4670_s16 + $0xc8] sm:$0xff]  ;;  %v3070_v32 = vor.u32 %v4032_v18, %v3069_v17 }
  0x72   : > { %1671 = vmatpush.bf16.msrb.mxu0 %v3494_v62  ;;  %v4089_v42 = vld [vmem:[#allocation5 + $0x2c4] sm:$0xf]  ;;  %v3559_v50 = vld [vmem:[#allocation5 + $0x4d0] sm:$0xf0]  ;;  %v3178_v57 = vor.u32 %v4057_v37, %v3175_v38  ;;  %1784 = vmatpush.bf16.msra.mxu2 %v3386_v46 }
  0x73   : > { %1728 = vmatpush.bf16.msrb.mxu3 %v2986_v63  ;;  %v4153_v45 = vld [vmem:[#allocation5 + $0x4c4] sm:$0xf]  ;;  %v3367_v54 = vld [vmem:[#allocation5 + $0x350] sm:$0xf0]  ;;  %v3306_v58 = vor.u32 %v4089_v42, %v3303_v44 }
  0x74   : > { %v4105_v51 = vld [vmem:[#allocation5 + $0x344] sm:$0xf]  ;;  %v3159_v60 = vld [vmem:[#allocation5 + $0x1b0] sm:$0xf0]  ;;  %v3562_v61 = vor.u32 %v4153_v45, %v3559_v50 }
  0x75   : > { %1691 = vmatpush.bf16.msrb.mxu1 %v3606_v4  ;;  %v4053_v59 = vld [vmem:[#allocation5 + $0x1a4] sm:$0xf]  ;;  %v3287_v63 = vld [vmem:[#allocation5 + $0x2b0] sm:$0xf0]  ;;  %v3370_v1 = vor.u32 %v4105_v51, %v3367_v54 }
  0x76   : > { %1672 = vmatpush.bf16.msrb.mxu0 %v3478_v10  ;;  %v4085_v62 = vld [vmem:[#allocation5 + $0x2a4] sm:$0xf]  ;;  %v3543_v2 = vld [vmem:[#allocation5 + $0x4b0] sm:$0xf0]  ;;  %v3162_v5 = vor.u32 %v4053_v59, %v3159_v60  ;;  %v4028_v59 = vld [vmem:[#allocation5 + $0xd4] sm:$0xf0] }
  0x77   : > { %1729 = vmatpush.bf16.msrb.mxu3 %v2970_v14  ;;  %v4149_v0 = vld [vmem:[#allocation5 + $0x4a4] sm:$0xf]  ;;  %v3351_v4 = vld [vmem:[#allocation5 + $0x330] sm:$0xf0]  ;;  %v3290_v6 = vor.u32 %v4085_v62, %v3287_v63  ;;  %1785 = vmatpush.bf16.msra.mxu2 %v3370_v1 }
  0x78   : > { %v4101_v3 = vld [vmem:[#allocation5 + $0x324] sm:$0xf]  ;;  %v3143_v8 = vld [vmem:[#allocation5 + $0x190] sm:$0xf0]  ;;  %v3546_v9 = vor.u32 %v4149_v0, %v3543_v2 }
  0x79   : > { %1692 = vmatpush.bf16.msrb.mxu1 %v3590_v19  ;;  %v4049_v7 = vld [vmem:[#allocation5 + $0x184] sm:$0xf]  ;;  %v3271_v11 = vld [vmem:[#allocation5 + $0x290] sm:$0xf0]  ;;  %v3354_v13 = vor.u32 %v4101_v3, %v3351_v4 }
  0x7a   : > { %1673 = vmatpush.bf16.msrb.mxu0 %v3462_v29  ;;  %v4081_v10 = vld [vmem:[#allocation5 + $0x284] sm:$0xf]  ;;  %v3527_v14 = vld [vmem:[#allocation5 + $0x490] sm:$0xf0]  ;;  %v3146_v19 = vor.u32 %v4049_v7, %v3143_v8  ;;  %v374_v29 = vld [vmem:[%s4670_s16 + $0x98] sm:$0xff] }
  0x7b   : > { %1730 = vmatpush.bf16.msrb.mxu3 %v2954_v33  ;;  %v4145_v12 = vld [vmem:[#allocation5 + $0x484] sm:$0xf]  ;;  %v3335_v16 = vld [vmem:[#allocation5 + $0x310] sm:$0xf0]  ;;  %v3274_v20 = vor.u32 %v4081_v10, %v3271_v11  ;;  %1786 = vmatpush.bf16.msra.mxu2 %v3354_v13  ;;  %v3037_v7 = vld [vmem:[#allocation5 + $0xa8] sm:$0xf] }
  0x7c   : > { %1693 = vmatmul.bf16.vlgmr.msrb.gmra.mxu1 %v4732_v49  ;;  %v4097_v15 = vld [vmem:[#allocation5 + $0x304] sm:$0xf]  ;;  %v3530_v22 = vor.u32 %v4145_v12, %v3527_v14  ;;  %v373_v23 = vld [vmem:[%s4670_s16 + $0x90] sm:$0xff]  ;;  %v4024_v8 = vld [vmem:[#allocation5 + $0xb4] sm:$0xf0] }
  0x7d   : > { %1761 = vmatpush.bf16.msra.mxu1 %v3322_v25  ;;  %1674 = vmatmul.bf16.vlgmr.msrb.gmra.mxu0 %v4730_v47  ;;  %v4045_v21 = vld [vmem:[#allocation5 + $0x164] sm:$0xf]  ;;  %v3127_v25 = vld [vmem:[#allocation5 + $0x170] sm:$0xf0]  ;;  %v3338_v28 = vor.u32 %v4097_v15, %v3335_v16  ;;  %v4747_v51 = vpack.c.bf16 %v380_v24, %v373_v23  ;;  %v3038_v18 = vor.u32 %v4024_v8, %v3037_v7  ;;  %v4052_v7 = vld [vmem:[#allocation5 + $0x194] sm:$0xf0] }
  0x7e   : > { %1742 = vmatpush.bf16.msra.mxu0 %v3194_v36  ;;  %3731 = vmatmul.msk.bf16.vlgmr.msrb.gmra.mxu2 %vm1583_vm0, %v4734_v55  ;;  %v4077_v26 = vld [vmem:[#allocation5 + $0x264] sm:$0xf]  ;;  %v3255_v27 = vld [vmem:[#allocation5 + $0x270] sm:$0xf0]  ;;  %v382_v36 = vld [vmem:[%s4670_s16 + $0xd8] sm:$0xff]  ;;  %v3130_v37 = vor.u32 %v4045_v21, %v3127_v25 }
  0x7f   : > { %1799 = vmatpush.bf16.msra.mxu3 %v3578_v41  ;;  %v4141_v30 = vld [vmem:[#allocation5 + $0x464] sm:$0xf]  ;;  %v3511_v31 = vld [vmem:[#allocation5 + $0x470] sm:$0xf0]  ;;  %v3258_v38 = vor.u32 %v4077_v26, %v3255_v27  ;;  %1787 = vmatpush.bf16.msra.mxu2 %v3338_v28  ;;  %v3197_v21 = vld [vmem:[#allocation5 + $0x1e8] sm:$0xf] }
  0x80   : > { %1731 = vmatmul.bf16.vlgmr.msrb.gmra.mxu3 %v4692_v48  ;;  %v381_v33 = vld [vmem:[%s4670_s16 + $0xd0] sm:$0xff]  ;;  %v375_v35 = vld [vmem:[%s4670_s16 + $0xa0] sm:$0xff]  ;;  %v3514_v44 = vor.u32 %v4141_v30, %v3511_v31  ;;  %v3021_v27 = vld [vmem:[#allocation5 + $0x88] sm:$0xf] }
  0x81   : > { %1762 = vmatpush.bf16.msra.mxu1 %v3306_v58  ;;  %v4041_v41 = vld [vmem:[#allocation5 + $0x144] sm:$0xf]  ;;  %v3111_v42 = vld [vmem:[#allocation5 + $0x150] sm:$0xf0]  ;;  %v4749_v54 = vpack.c.bf16 %v381_v33, %v374_v29  ;;  %v3053_v58 = vld [vmem:[#allocation5 + $0xc8] sm:$0xf]  ;;  %v4751_v60 = vpack.c.bf16 %v382_v36, %v375_v35 }
  0x82   : > { %1743 = vmatpush.bf16.msra.mxu0 %v3178_v57  ;;  %v4073_v45 = vld [vmem:[#allocation5 + $0x244] sm:$0xf]  ;;  %v3239_v46 = vld [vmem:[#allocation5 + $0x250] sm:$0xf0]  ;;  %v4020_v28 = vld [vmem:[#allocation5 + $0x94] sm:$0xf0] }
  0x83   : > { %1800 = vmatpush.bf16.msra.mxu3 %v3562_v61  ;;  %v4137_v50 = vld [vmem:[#allocation5 + $0x444] sm:$0xf]  ;;  %v3495_v57 = vld [vmem:[#allocation5 + $0x450] sm:$0xf0]  ;;  %1856 = vmatpush.bf16.msrb.mxu2 %v3070_v32  ;;  %v3114_v61 = vor.u32 %v4041_v41, %v3111_v42  ;;  %v3242_v62 = vor.u32 %v4073_v45, %v3239_v46  ;;  %v3022_v36 = vor.u32 %v4020_v28, %v3021_v27  ;;  %v4060_v41 = vld [vmem:[#allocation5 + $0x1d4] sm:$0xf0] }
  0x84   : > { %v4037_v63 = vld [vmem:[#allocation5 + $0x124] sm:$0xf]  ;;  %v3095_v0 = vld [vmem:[#allocation5 + $0x130] sm:$0xf0]  ;;  %v3498_v1 = vor.u32 %v4137_v50, %v3495_v57  ;;  %v3005_v42 = vld [vmem:[#allocation5 + $0x68] sm:$0xf] }
  0x85   : > { %1763 = vmatpush.bf16.msra.mxu1 %v3290_v6  ;;  %v4069_v2 = vld [vmem:[#allocation5 + $0x224] sm:$0xf]  ;;  %v3223_v3 = vld [vmem:[#allocation5 + $0x230] sm:$0xf0]  ;;  %v3165_v57 = vld [vmem:[#allocation5 + $0x1a8] sm:$0xf] }
  0x86   : > { %1744 = vmatpush.bf16.msra.mxu0 %v3162_v5  ;;  %v4133_v4 = vld [vmem:[#allocation5 + $0x424] sm:$0xf]  ;;  %v3054_v5 = vor.u32 %v4028_v59, %v3053_v58  ;;  %v3479_v6 = vld [vmem:[#allocation5 + $0x430] sm:$0xf0]  ;;  %v3226_v10 = vor.u32 %v4069_v2, %v3223_v3  ;;  %v4056_v58 = vld [vmem:[#allocation5 + $0x1b4] sm:$0xf0] }
  0x87   : > { %1801 = vmatpush.bf16.msra.mxu3 %v3546_v9  ;;  %v3098_v9 = vor.u32 %v4037_v63, %v3095_v0  ;;  %v4033_v11 = vld [vmem:[#allocation5 + $0x104] sm:$0xf]  ;;  %v3079_v12 = vld [vmem:[#allocation5 + $0x110] sm:$0xf0]  ;;  %v3482_v14 = vor.u32 %v4133_v4, %v3479_v6  ;;  %v2989_v63 = vld [vmem:[#allocation5 + $0x48] sm:$0xf] }
  0x88   : > { %v4065_v13 = vld [vmem:[#allocation5 + $0x204] sm:$0xf]  ;;  %v3207_v15 = vld [vmem:[#allocation5 + $0x210] sm:$0xf0]  ;;  %1857 = vmatpush.bf16.msrb.mxu2 %v3054_v5  ;;  %v3082_v25 = vor.u32 %v4033_v11, %v3079_v12  ;;  %v4012_v0 = vld [vmem:[#allocation5 + $0x54] sm:$0xf0]  ;;  %v3166_v5 = vor.u32 %v4056_v58, %v3165_v57 }
  0x89   : > { %1764 = vmatpush.bf16.msra.mxu1 %v3274_v20  ;;  %v4129_v16 = vld [vmem:[#allocation5 + $0x404] sm:$0xf]  ;;  %v3463_v17 = vld [vmem:[#allocation5 + $0x410] sm:$0xf0]  ;;  %v3210_v26 = vor.u32 %v4065_v13, %v3207_v15  ;;  %v3453_v2 = vld [vmem:[#allocation5 + $0x3e8] sm:$0xf]  ;;  %v2990_v8 = vor.u32 %v4012_v0, %v2989_v63 }
  0x8a   : > { %1745 = vmatpush.bf16.msra.mxu0 %v3146_v19  ;;  %v4189_v19 = vld [vmem:[#allocation5 + $0x5e4] sm:$0xf]  ;;  %v3703_v20 = vld [vmem:[#allocation5 + $0x5f0] sm:$0xf0]  ;;  %v3466_v29 = vor.u32 %v4129_v16, %v3463_v17  ;;  %v4128_v3 = vld [vmem:[#allocation5 + $0x3f4] sm:$0xf0] }
  0x8b   : > { %1802 = vmatpush.bf16.msra.mxu3 %v3530_v22  ;;  %v4064_v22 = vld [vmem:[#allocation5 + $0x1f4] sm:$0xf0]  ;;  %v4193_v23 = vld [vmem:[#allocation5 + $0x604] sm:$0xf]  ;;  %v3719_v24 = vld [vmem:[#allocation5 + $0x610] sm:$0xf0]  ;;  %v3706_v30 = vor.u32 %v4189_v19, %v3703_v20  ;;  %v3454_v4 = vor.u32 %v4128_v3, %v3453_v2 }
  0x8c   : > { %1698 = vmatmul.bf16.gmra.mxu1 %v4749_v54  ;;  %1858 = vmatpush.bf16.msrb.mxu2 %v3038_v18  ;;  %v3198_v31 = vor.u32 %v4064_v22, %v3197_v21  ;;  %v3722_v32 = vor.u32 %v4193_v23, %v3719_v24  ;;  %v4185_v33 = vld [vmem:[#allocation5 + $0x5c4] sm:$0xf]  ;;  %v3687_v35 = vld [vmem:[#allocation5 + $0x5d0] sm:$0xf0]  ;;  %v3149_v6 = vld [vmem:[#allocation5 + $0x188] sm:$0xf] }
  0x8d   : > { %1765 = vmatpush.bf16.msra.mxu1 %v3258_v38  ;;  %1679 = vmatmul.bf16.gmra.mxu0 %v4747_v51  ;;  %v3690_v38 = vor.u32 %v4185_v33, %v3687_v35  ;;  %v4181_v45 = vld [vmem:[#allocation5 + $0x5a4] sm:$0xf]  ;;  %v3671_v46 = vld [vmem:[#allocation5 + $0x5b0] sm:$0xf0]  ;;  %v4008_v11 = vld [vmem:[#allocation5 + $0x34] sm:$0xf0]  ;;  %v3150_v18 = vor.u32 %v4052_v7, %v3149_v6 }
  0x8e   : > { %1746 = vmatpush.bf16.msra.mxu0 %v3130_v37  ;;  %3732 = vmatmul.msk.bf16.gmra.mxu2 %vm1583_vm0, %v4751_v60  ;;  %v3181_v37 = vld [vmem:[#allocation5 + $0x1c8] sm:$0xf]  ;;  %v4124_v13 = vld [vmem:[#allocation5 + $0x3d4] sm:$0xf0]  ;;  %v3639_v15 = vld [vmem:[#allocation5 + $0x570] sm:$0xf0] }
  0x8f   : > { %1803 = vmatpush.bf16.msra.mxu3 %v3514_v44  ;;  %v4016_v44 = vld [vmem:[#allocation5 + $0x74] sm:$0xf0]  ;;  %v3182_v50 = vor.u32 %v4060_v41, %v3181_v37  ;;  %v3437_v12 = vld [vmem:[#allocation5 + $0x3c8] sm:$0xf]  ;;  %v4169_v24 = vld [vmem:[#allocation5 + $0x544] sm:$0xf] }
  0x90   : > { %1736 = vmatmul.bf16.gmra.mxu3 %v4712_v34  ;;  %1859 = vmatpush.bf16.msrb.mxu2 %v3022_v36  ;;  %v3006_v59 = vor.u32 %v4016_v44, %v3005_v42  ;;  %v3438_v16 = vor.u32 %v4124_v13, %v3437_v12  ;;  %v3421_v17 = vld [vmem:[#allocation5 + $0x3a8] sm:$0xf]  ;;  %v4048_v20 = vld [vmem:[#allocation5 + $0x174] sm:$0xf0]  ;;  %v3623_v28 = vld [vmem:[#allocation5 + $0x550] sm:$0xf0] }
  0x91   : > { %1766 = vmatpush.bf16.msra.mxu1 %v3242_v62  ;;  %v4177_v62 = vld [vmem:[#allocation5 + $0x584] sm:$0xf]  ;;  %v3133_v19 = vld [vmem:[#allocation5 + $0x168] sm:$0xf]  ;;  %v4120_v22 = vld [vmem:[#allocation5 + $0x3b4] sm:$0xf0]  ;;  %v3626_v36 = vor.u32 %v4169_v24, %v3623_v28 }
  0x92   : > { %1747 = vmatpush.bf16.msra.mxu0 %v3114_v61  ;;  %v3674_v61 = vor.u32 %v4181_v45, %v3671_v46  ;;  %v3422_v27 = vor.u32 %v4120_v22, %v3421_v17  ;;  %v4044_v33 = vld [vmem:[#allocation5 + $0x154] sm:$0xf0]  ;;  %v4165_v37 = vld [vmem:[#allocation5 + $0x524] sm:$0xf]  ;;  %v3405_v41 = vld [vmem:[#allocation5 + $0x388] sm:$0xf] }
  0x93   : > { %1804 = vmatpush.bf16.msra.mxu3 %v3498_v1  ;;  %v3655_v1 = vld [vmem:[#allocation5 + $0x590] sm:$0xf0]  ;;  %v4116_v42 = vld [vmem:[#allocation5 + $0x394] sm:$0xf0]  ;;  %v3565_v45 = vld [vmem:[#allocation5 + $0x4c8] sm:$0xf] }
  0x94   : > { %1860 = vmatpush.bf16.msrb.mxu2 %v3006_v59  ;;  %v3607_v44 = vld [vmem:[#allocation5 + $0x530] sm:$0xf0]  ;;  %v4156_v46 = vld [vmem:[#allocation5 + $0x4d4] sm:$0xf0]  ;;  %v3101_v57 = vld [vmem:[#allocation5 + $0x128] sm:$0xf]  ;;  %v3406_v59 = vor.u32 %v4116_v42, %v3405_v41 }
  0x95   : > { %1767 = vmatpush.bf16.msra.mxu1 %v3226_v10  ;;  %v3658_v10 = vor.u32 %v4177_v62, %v3655_v1  ;;  %v4040_v58 = vld [vmem:[#allocation5 + $0x134] sm:$0xf0]  ;;  %v4161_v62 = vld [vmem:[#allocation5 + $0x504] sm:$0xf]  ;;  %v3591_v63 = vld [vmem:[#allocation5 + $0x510] sm:$0xf0]  ;;  %v3566_v0 = vor.u32 %v4156_v46, %v3565_v45 }
  0x96   : > { %1748 = vmatpush.bf16.msra.mxu0 %v3098_v9  ;;  %v2973_v9 = vld [vmem:[#allocation5 + $0x28] sm:$0xf]  ;;  %v4152_v2 = vld [vmem:[#allocation5 + $0x4b4] sm:$0xf0]  ;;  %v3102_v7 = vor.u32 %v4040_v58, %v3101_v57 }
  0x97   : > { %1805 = vmatpush.bf16.msra.mxu3 %v3482_v14  ;;  %v4173_v14 = vld [vmem:[#allocation5 + $0x564] sm:$0xf]  ;;  %v2974_v21 = vor.u32 %v4008_v11, %v2973_v9  ;;  %v3549_v1 = vld [vmem:[#allocation5 + $0x4a8] sm:$0xf]  ;;  %v4096_v6 = vld [vmem:[#allocation5 + $0x2f4] sm:$0xf0]  ;;  %v3594_v11 = vor.u32 %v4161_v62, %v3591_v63 }
  0x98   : > { %1861 = vmatpush.bf16.msrb.mxu2 %v2990_v8  ;;  %v3642_v23 = vor.u32 %v4173_v14, %v3639_v15  ;;  %v3389_v3 = vld [vmem:[#allocation5 + $0x368] sm:$0xf]  ;;  %v4036_v9 = vld [vmem:[#allocation5 + $0x114] sm:$0xf0]  ;;  %v3550_v13 = vor.u32 %v4152_v2, %v3549_v1  ;;  %v4030_v2 = vld [vmem:[#allocation5 + $0xec] sm:$0xf] }
  0x99   : > { %1768 = vmatpush.bf16.msra.mxu1 %v3210_v26  ;;  %v4004_v26 = vld [vmem:[#allocation5 + $0x14] sm:$0xf0]  ;;  %v3085_v8 = vld [vmem:[#allocation5 + $0x108] sm:$0xf] }
  0x9a   : > { %1749 = vmatpush.bf16.msra.mxu0 %v3082_v25  ;;  %v2957_v25 = vld [vmem:[#allocation5 + $0x8] sm:$0xf]  ;;  %v4108_v15 = vld [vmem:[#allocation5 + $0x354] sm:$0xf0]  ;;  %v3086_v22 = vor.u32 %v4036_v9, %v3085_v8 }
  0x9b   : > { %1806 = vmatpush.bf16.msra.mxu3 %v3466_v29  ;;  %v3581_v29 = vld [vmem:[#allocation5 + $0x4e8] sm:$0xf]  ;;  %v2958_v35 = vor.u32 %v4004_v26, %v2957_v25  ;;  %v4192_v17 = vld [vmem:[#allocation5 + $0x5f4] sm:$0xf0] }
  0x9c   : > { %1769 = vmatmul.bf16.vlgmr.msra.gmra.mxu1 %v4696_v53  ;;  %1862 = vmatpush.bf16.msrb.mxu2 %v2974_v21  ;;  %v3709_v12 = vld [vmem:[#allocation5 + $0x5e8] sm:$0xf]  ;;  %v4092_v21 = vld [vmem:[#allocation5 + $0x2d4] sm:$0xf0] }
  0x9d   : > { %1844 = vmatpush.bf16.msrb.mxu1 %v3722_v32  ;;  %1750 = vmatmul.bf16.vlgmr.msra.gmra.mxu0 %v4694_v52  ;;  %v3117_v32 = vld [vmem:[#allocation5 + $0x148] sm:$0xf]  ;;  %v3710_v24 = vor.u32 %v4192_v17, %v3709_v12  ;;  %v4104_v28 = vld [vmem:[#allocation5 + $0x334] sm:$0xf0]  ;;  %v3055_v17 = vld [vmem:[#allocation5 + $0xd8] sm:$0xf0] }
  0x9e   : > { %1818 = vmatpush.bf16.msrb.mxu0 %v3706_v30  ;;  %1788 = vmatmul.bf16.vlgmr.msra.gmra.mxu2 %v4698_v56  ;;  %v4160_v30 = vld [vmem:[#allocation5 + $0x4f4] sm:$0xf0]  ;;  %v3373_v14 = vld [vmem:[#allocation5 + $0x348] sm:$0xf] }
  0x9f   : > { %1875 = vmatpush.bf16.msrb.mxu3 %v3198_v31  ;;  %v3134_v31 = vor.u32 %v4048_v20, %v3133_v19  ;;  %v4148_v19 = vld [vmem:[#allocation5 + $0x494] sm:$0xf0]  ;;  %v3309_v20 = vld [vmem:[#allocation5 + $0x2c8] sm:$0xf] }
  0xa0   : > { %1807 = vmatmul.bf16.vlgmr.msra.gmra.mxu3 %v4730_v47  ;;  %1863 = vmatpush.bf16.msrb.mxu2 %v2958_v35  ;;  %v3693_v25 = vld [vmem:[#allocation5 + $0x5c8] sm:$0xf]  ;;  %v4088_v35 = vld [vmem:[#allocation5 + $0x2b4] sm:$0xf0] }
  0xa1   : > { %1913 = vmatpush.bf16.msra.mxu1 %v3454_v4  ;;  %v4112_v4 = vld [vmem:[#allocation5 + $0x374] sm:$0xf0]  ;;  %v3501_v45 = vld [vmem:[#allocation5 + $0x448] sm:$0xf] }
  0xa2   : > { %1819 = vmatpush.bf16.msrb.mxu0 %v3690_v38  ;;  %v3582_v38 = vor.u32 %v4160_v30, %v3581_v29  ;;  %v3310_v29 = vor.u32 %v4092_v21, %v3309_v20  ;;  %v4188_v30 = vld [vmem:[#allocation5 + $0x5d4] sm:$0xf0]  ;;  %v3277_v58 = vld [vmem:[#allocation5 + $0x288] sm:$0xf] }
  0xa3   : > { %1876 = vmatpush.bf16.msrb.mxu3 %v3182_v50  ;;  %v3118_v50 = vor.u32 %v4044_v33, %v3117_v32  ;;  %v4144_v32 = vld [vmem:[#allocation5 + $0x474] sm:$0xf0]  ;;  %v3293_v33 = vld [vmem:[#allocation5 + $0x2a8] sm:$0xf] }
  0xa4   : > { %1932 = vmatpush.bf16.msra.mxu2 %v3582_v38  ;;  %v3677_v38 = vld [vmem:[#allocation5 + $0x5a8] sm:$0xf]  ;;  %v4184_v41 = vld [vmem:[#allocation5 + $0x5b4] sm:$0xf0]  ;;  %v3294_v57 = vor.u32 %v4088_v35, %v3293_v33 }
  0xa5   : > { %1914 = vmatpush.bf16.msra.mxu1 %v3438_v16  ;;  %v4140_v46 = vld [vmem:[#allocation5 + $0x454] sm:$0xf0]  ;;  %v3678_v62 = vor.u32 %v4184_v41, %v3677_v38  ;;  %v3661_v63 = vld [vmem:[#allocation5 + $0x588] sm:$0xf]  ;;  %v4058_v38 = vld [vmem:[#allocation5 + $0x1cc] sm:$0xf] }
  0xa6   : > { %1820 = vmatpush.bf16.msrb.mxu0 %v3674_v61  ;;  %v3610_v61 = vor.u32 %v4165_v37, %v3607_v44  ;;  %v3694_v37 = vor.u32 %v4188_v30, %v3693_v25  ;;  %v3341_v44 = vld [vmem:[#allocation5 + $0x308] sm:$0xf]  ;;  %v3502_v1 = vor.u32 %v4140_v46, %v3501_v45  ;;  %v4080_v9 = vld [vmem:[#allocation5 + $0x274] sm:$0xf0]  ;;  %v3039_v30 = vld [vmem:[#allocation5 + $0xb8] sm:$0xf0] }
  0xa7   : > { %1877 = vmatpush.bf16.msrb.mxu3 %v3166_v5  ;;  %v3325_v5 = vld [vmem:[#allocation5 + $0x2e8] sm:$0xf]  ;;  %v4176_v12 = vld [vmem:[#allocation5 + $0x574] sm:$0xf0]  ;;  %v3183_v41 = vld [vmem:[#allocation5 + $0x1d8] sm:$0xf0] }
  0xa8   : > { %1933 = vmatpush.bf16.msra.mxu2 %v3566_v0  ;;  %v3326_v16 = vor.u32 %v4096_v6, %v3325_v5  ;;  %v4180_v0 = vld [vmem:[#allocation5 + $0x594] sm:$0xf0]  ;;  %v3071_v5 = vld [vmem:[#allocation5 + $0xf8] sm:$0xf0]  ;;  %v3261_v8 = vld [vmem:[#allocation5 + $0x268] sm:$0xf] }
  0xa9   : > { %1915 = vmatpush.bf16.msra.mxu1 %v3422_v27  ;;  %v3357_v27 = vld [vmem:[#allocation5 + $0x328] sm:$0xf]  ;;  %v3074_v6 = vor.u32 %v4030_v2, %v3071_v5  ;;  %v3262_v21 = vor.u32 %v4080_v9, %v3261_v8  ;;  %v4072_v35 = vld [vmem:[#allocation5 + $0x234] sm:$0xf0]  ;;  %v3023_v45 = vld [vmem:[#allocation5 + $0x98] sm:$0xf0] }
  0xaa   : > { %1821 = vmatpush.bf16.msrb.mxu0 %v3658_v10  ;;  %v3390_v10 = vor.u32 %v4112_v4, %v3389_v3  ;;  %v3485_v3 = vld [vmem:[#allocation5 + $0x428] sm:$0xf]  ;;  %v4136_v4 = vld [vmem:[#allocation5 + $0x434] sm:$0xf0]  ;;  %v4094_v2 = vld [vmem:[#allocation5 + $0x2ec] sm:$0xf] }
  0xab   : > { %1878 = vmatpush.bf16.msrb.mxu3 %v3150_v18  ;;  %v3533_v18 = vld [vmem:[#allocation5 + $0x488] sm:$0xf]  ;;  %v3327_v5 = vld [vmem:[#allocation5 + $0x2f8] sm:$0xf0] }
  0xac   : > { %1774 = vmatmul.bf16.gmra.mxu1 %v4716_v40  ;;  %1934 = vmatpush.bf16.msra.mxu2 %v3550_v13  ;;  %v3534_v26 = vor.u32 %v4148_v19, %v3533_v18  ;;  %v3486_v13 = vor.u32 %v4136_v4, %v3485_v3  ;;  %v4062_v18 = vld [vmem:[#allocation5 + $0x1ec] sm:$0xf]  ;;  %v3199_v19 = vld [vmem:[#allocation5 + $0x1f8] sm:$0xf0]  ;;  %v3229_v33 = vld [vmem:[#allocation5 + $0x228] sm:$0xf] }
  0xad   : > { %1755 = vmatmul.bf16.gmra.mxu0 %v4714_v39  ;;  %1916 = vmatpush.bf16.msra.mxu1 %v3406_v59  ;;  %v4084_v59 = vld [vmem:[#allocation5 + $0x294] sm:$0xf0]  ;;  %v3230_v46 = vor.u32 %v4072_v35, %v3229_v33  ;;  %v3725_v3 = vld [vmem:[#allocation5 + $0x608] sm:$0xf]  ;;  %v4006_v33 = vld [vmem:[#allocation5 + $0x2c] sm:$0xf] }
  0xae   : > { %1822 = vmatpush.bf16.msrb.mxu0 %v3642_v23  ;;  %1793 = vmatmul.bf16.gmra.mxu2 %v4718_v43  ;;  %v3374_v23 = vor.u32 %v4108_v15, %v3373_v14  ;;  %v4026_v14 = vld [vmem:[#allocation5 + $0xcc] sm:$0xf]  ;;  %v3469_v15 = vld [vmem:[#allocation5 + $0x408] sm:$0xf]  ;;  %v4196_v4 = vld [vmem:[#allocation5 + $0x614] sm:$0xf0] }
  0xaf   : > { %1879 = vmatpush.bf16.msrb.mxu3 %v3134_v31  ;;  %v3517_v31 = vld [vmem:[#allocation5 + $0x468] sm:$0xf]  ;;  %v3058_v20 = vor.u32 %v4026_v14, %v3055_v17  ;;  %v3330_v14 = vor.u32 %v4094_v2, %v3327_v5  ;;  %v3311_v17 = vld [vmem:[#allocation5 + $0x2d8] sm:$0xf0] }
  0xb0   : > { %1812 = vmatmul.bf16.gmra.mxu3 %v4747_v51  ;;  %1935 = vmatpush.bf16.msra.mxu2 %v3534_v26  ;;  %v3518_v42 = vor.u32 %v4144_v32, %v3517_v31  ;;  %v4022_v26 = vld [vmem:[#allocation5 + $0xac] sm:$0xf]  ;;  %v2975_v35 = vld [vmem:[#allocation5 + $0x38] sm:$0xf0] }
  0xb1   : > { %1917 = vmatpush.bf16.msra.mxu1 %v3390_v10  ;;  %v3662_v10 = vor.u32 %v4180_v0, %v3661_v63  ;;  %v3042_v31 = vor.u32 %v4022_v26, %v3039_v30  ;;  %v4054_v63 = vld [vmem:[#allocation5 + $0x1ac] sm:$0xf]  ;;  %v3167_v0 = vld [vmem:[#allocation5 + $0x1b8] sm:$0xf0] }
  0xb2   : > { %1823 = vmatpush.bf16.msrb.mxu0 %v3626_v36  ;;  %v3358_v36 = vor.u32 %v4104_v28, %v3357_v27  ;;  %v3629_v27 = vld [vmem:[#allocation5 + $0x548] sm:$0xf]  ;;  %v4172_v28 = vld [vmem:[#allocation5 + $0x554] sm:$0xf0]  ;;  %v3170_v9 = vor.u32 %v4054_v63, %v3167_v0  ;;  %v4042_v30 = vld [vmem:[#allocation5 + $0x14c] sm:$0xf] }
  0xb3   : > { %1880 = vmatpush.bf16.msrb.mxu3 %v3118_v50  ;;  %v4100_v50 = vld [vmem:[#allocation5 + $0x314] sm:$0xf0]  ;;  %v4158_v0 = vld [vmem:[#allocation5 + $0x4ec] sm:$0xf] }
  0xb4   : > { %1936 = vmatpush.bf16.msra.mxu2 %v3518_v42  ;;  %v4168_v42 = vld [vmem:[#allocation5 + $0x534] sm:$0xf0] }
  0xb5   : > { %1918 = vmatpush.bf16.msra.mxu1 %v3374_v23  ;;  %v3245_v23 = vld [vmem:[#allocation5 + $0x248] sm:$0xf] }
  0xb6   : > { %1824 = vmatpush.bf16.msrb.mxu0 %v3610_v61  ;;  %v3342_v61 = vor.u32 %v4100_v50, %v3341_v44  ;;  %v4018_v44 = vld [vmem:[#allocation5 + $0x8c] sm:$0xf]  ;;  %v3213_v50 = vld [vmem:[#allocation5 + $0x208] sm:$0xf] }
  0xb7   : > { %1881 = vmatpush.bf16.msrb.mxu3 %v3102_v7  ;;  %v3278_v7 = vor.u32 %v4084_v59, %v3277_v58  ;;  %v3597_v58 = vld [vmem:[#allocation5 + $0x508] sm:$0xf]  ;;  %v3186_v59 = vor.u32 %v4058_v38, %v3183_v41  ;;  %v4082_v41 = vld [vmem:[#allocation5 + $0x28c] sm:$0xf] }
  0xb8   : > { %1937 = vmatpush.bf16.msra.mxu2 %v3502_v1  ;;  %v3026_v1 = vor.u32 %v4018_v44, %v3023_v45 }
  0xb9   : > { %1919 = vmatpush.bf16.msra.mxu1 %v3358_v36  ;;  %v3630_v36 = vor.u32 %v4172_v28, %v3629_v27  ;;  %v4086_v27 = vld [vmem:[#allocation5 + $0x2ac] sm:$0xf] }
  0xba   : > { %1825 = vmatpush.bf16.msrb.mxu0 %v3594_v11  ;;  %v3645_v11 = vld [vmem:[#allocation5 + $0x568] sm:$0xf] }
  0xbb   : > { %1882 = vmatpush.bf16.msrb.mxu3 %v3086_v22  ;;  %v3646_v22 = vor.u32 %v4176_v12, %v3645_v11  ;;  %v3726_v11 = vor.u32 %v4196_v4, %v3725_v3  ;;  %v4050_v12 = vld [vmem:[#allocation5 + $0x18c] sm:$0xf]  ;;  %v3263_v4 = vld [vmem:[#allocation5 + $0x278] sm:$0xf0] }
  0xbc   : > { %3733 = vmatmul.msk.bf16.vlgmr.msrb.gmra.mxu1 %vm1583_vm0, %v4734_v55  ;;  %1938 = vmatpush.bf16.msra.mxu2 %v3486_v13  ;;  %v3151_v13 = vld [vmem:[#allocation5 + $0x198] sm:$0xf0]  ;;  %v4078_v3 = vld [vmem:[#allocation5 + $0x26c] sm:$0xf] }
  0xbd   : > { %1826 = vmatmul.bf16.vlgmr.msrb.gmra.mxu0 %v4732_v49  ;;  %1920 = vmatpush.bf16.msra.mxu1 %v3342_v61 }
  0xbe   : > { %1894 = vmatpush.bf16.msra.mxu0 %v3326_v16  ;;  %1864 = vmatmul.bf16.vlgmr.msrb.gmra.mxu2 %v4692_v48  ;;  %v4132_v16 = vld [vmem:[#allocation5 + $0x414] sm:$0xf0] }
  0xbf   : > { %1951 = vmatpush.bf16.msra.mxu3 %v3710_v24  ;;  %v4076_v24 = vld [vmem:[#allocation5 + $0x254] sm:$0xf0]  ;;  %v3470_v25 = vor.u32 %v4132_v16, %v3469_v15  ;;  %v4090_v15 = vld [vmem:[#allocation5 + $0x2cc] sm:$0xf] }
  0xc0   : > { %1883 = vmatmul.bf16.vlgmr.msrb.gmra.mxu3 %v4694_v52  ;;  %v3246_v32 = vor.u32 %v4076_v24, %v3245_v23  ;;  %v3135_v23 = vld [vmem:[#allocation5 + $0x178] sm:$0xf0]  ;;  %v3314_v24 = vor.u32 %v4090_v15, %v3311_v17 }
  0xc1   : > { %1989 = vmatpush.bf16.msrb.mxu1 %v3074_v6  ;;  %1939 = vmatpush.bf16.msra.mxu2 %v3470_v25  ;;  %v4014_v6 = vld [vmem:[#allocation5 + $0x6c] sm:$0xf]  ;;  %v3711_v15 = vld [vmem:[#allocation5 + $0x5f8] sm:$0xf0] }
  0xc2   : > { %1895 = vmatpush.bf16.msra.mxu0 %v3310_v29  ;;  %v3202_v29 = vor.u32 %v4062_v18, %v3199_v19  ;;  %v4010_v18 = vld [vmem:[#allocation5 + $0x4c] sm:$0xf]  ;;  %v2991_v19 = vld [vmem:[#allocation5 + $0x58] sm:$0xf0] }
  0xc3   : > { %1952 = vmatpush.bf16.msra.mxu3 %v3694_v37  ;;  %v3613_v37 = vld [vmem:[#allocation5 + $0x528] sm:$0xf]  ;;  %v2994_v25 = vor.u32 %v4010_v18, %v2991_v19  ;;  %v3439_v17 = vld [vmem:[#allocation5 + $0x3d8] sm:$0xf0] }
  0xc4   : > { %v3614_v61 = vor.u32 %v4168_v42, %v3613_v37  ;;  %v3279_v42 = vld [vmem:[#allocation5 + $0x298] sm:$0xf0] }
  0xc5   : > { %1990 = vmatpush.bf16.msrb.mxu1 %v3058_v20  ;;  %2008 = vmatpush.bf16.msrb.mxu2 %v3202_v29  ;;  %v4776_v20 = vld [vmem:[#allocation7] sm:$0xf]  ;;  %v3295_v29 = vld [vmem:[#allocation5 + $0x2b8] sm:$0xf0]  ;;  %v3282_v2 = vor.u32 %v4082_v41, %v3279_v42  ;;  %v4070_v42 = vld [vmem:[#allocation5 + $0x22c] sm:$0xf] }
  0xc6   : > { %1896 = vmatpush.bf16.msra.mxu0 %v3294_v57  ;;  %v4068_v57 = vld [vmem:[#allocation5 + $0x214] sm:$0xf0]  ;;  %v4779_v26 = vperm.slane %v4776_v20, 0  ;;  %v3298_v38 = vor.u32 %v4086_v27, %v3295_v29  ;;  %v4074_v29 = vld [vmem:[#allocation5 + $0x24c] sm:$0xf] }
  0xc7   : > { %1953 = vmatpush.bf16.msra.mxu3 %v3678_v62  ;;  %v4164_v62 = vld [vmem:[#allocation5 + $0x514] sm:$0xf0]  ;;  %v3214_v8 = vor.u32 %v4068_v57, %v3213_v50  ;;  %v3103_v50 = vld [vmem:[#allocation5 + $0x138] sm:$0xf0]  ;;  %v2978_v57 = vor.u32 %v4006_v33, %v2975_v35  ;;  %v4186_v33 = vld [vmem:[#allocation5 + $0x5cc] sm:$0xf] }
  0xc8   : > { %v3695_v35 = vld [vmem:[#allocation5 + $0x5d8] sm:$0xf0] }
  0xc9   : > { %1991 = vmatpush.bf16.msrb.mxu1 %v3042_v31  ;;  %2009 = vmatpush.bf16.msrb.mxu2 %v3186_v59  ;;  %v3119_v31 = vld [vmem:[#allocation5 + $0x158] sm:$0xf0]  ;;  %v4002_v59 = vld [vmem:[#allocation5 + $0xc] sm:$0xf] }
  0xca   : > { %1897 = vmatpush.bf16.msra.mxu0 %v3278_v7  ;;  %v3007_v7 = vld [vmem:[#allocation5 + $0x78] sm:$0xf0]  ;;  %v3122_v44 = vor.u32 %v4042_v30, %v3119_v31 }
  0xcb   : > { %1954 = vmatpush.bf16.msra.mxu3 %v3662_v10  ;;  %v3598_v10 = vor.u32 %v4164_v62, %v3597_v58  ;;  %v3010_v16 = vor.u32 %v4014_v6, %v3007_v7  ;;  %v4126_v58 = vld [vmem:[#allocation5 + $0x3ec] sm:$0xf]  ;;  %v3455_v62 = vld [vmem:[#allocation5 + $0x3f8] sm:$0xf0] }
  0xcc   : > { %3734 = vmatmul.msk.bf16.gmra.mxu1 %vm1583_vm0, %v4751_v60  ;;  %v3458_v63 = vor.u32 %v4126_v58, %v3455_v62  ;;  %v4034_v7 = vld [vmem:[#allocation5 + $0x10c] sm:$0xf]  ;;  %v3247_v30 = vld [vmem:[#allocation5 + $0x258] sm:$0xf0] }
  0xcd   : > { %1831 = vmatmul.bf16.gmra.mxu0 %v4749_v54  ;;  %1992 = vmatpush.bf16.msrb.mxu1 %v3026_v1  ;;  %v3583_v1 = vld [vmem:[#allocation5 + $0x4f8] sm:$0xf0]  ;;  %v3250_v41 = vor.u32 %v4074_v29, %v3247_v30  ;;  %v4114_v58 = vld [vmem:[#allocation5 + $0x38c] sm:$0xf] }
  0xce   : > { %1898 = vmatpush.bf16.msra.mxu0 %v3262_v21  ;;  %1869 = vmatmul.bf16.gmra.mxu2 %v4712_v34  ;;  %v3154_v21 = vor.u32 %v4050_v12, %v3151_v13  ;;  %v4142_v29 = vld [vmem:[#allocation5 + $0x46c] sm:$0xf]  ;;  %v3519_v30 = vld [vmem:[#allocation5 + $0x478] sm:$0xf0] }
  0xcf   : > { %1955 = vmatpush.bf16.msra.mxu3 %v3646_v22  ;;  %2010 = vmatpush.bf16.msrb.mxu2 %v3170_v9  ;;  %v4046_v22 = vld [vmem:[#allocation5 + $0x16c] sm:$0xf] }
  0xd0   : > { %1888 = vmatmul.bf16.gmra.mxu3 %v4714_v39  ;;  %v3138_v28 = vor.u32 %v4046_v22, %v3135_v23  ;;  %v4154_v22 = vld [vmem:[#allocation5 + $0x4cc] sm:$0xf]  ;;  %v3567_v23 = vld [vmem:[#allocation5 + $0x4d8] sm:$0xf0] }
  0xd1   : > { %1993 = vmatpush.bf16.msrb.mxu1 %v3010_v16  ;;  %v3586_v16 = vor.u32 %v4158_v0, %v3583_v1  ;;  %v3679_v0 = vld [vmem:[#allocation5 + $0x5b8] sm:$0xf0] }
  0xd2   : > { %1899 = vmatpush.bf16.msra.mxu0 %v3246_v32  ;;  %v3407_v1 = vld [vmem:[#allocation5 + $0x398] sm:$0xf0] }
  0xd3   : > { %1956 = vmatpush.bf16.msra.mxu3 %v3630_v36  ;;  %2011 = vmatpush.bf16.msrb.mxu2 %v3154_v21 }
  0xd5   : > { %1994 = vmatpush.bf16.msrb.mxu1 %v2994_v25  ;;  %v3266_v25 = vor.u32 %v4078_v3, %v3263_v4  ;;  %v4066_v4 = vld [vmem:[#allocation5 + $0x20c] sm:$0xf] }
  0xd6   : > { %1900 = vmatpush.bf16.msra.mxu0 %v3230_v46  ;;  %v4038_v46 = vld [vmem:[#allocation5 + $0x12c] sm:$0xf] }
  0xd7   : > { %1957 = vmatpush.bf16.msra.mxu3 %v3614_v61  ;;  %v1599_v32 = vpop.f32.mrf.mxu0  ;;  %2012 = vmatpush.bf16.msrb.mxu2 %v3138_v28  ;;  %v2959_v61 = vld [vmem:[#allocation5 + $0x18] sm:$0xf0]  ;;  %v3106_v5 = vor.u32 %v4038_v46, %v3103_v50  ;;  %v3698_v46 = vor.u32 %v4186_v33, %v3695_v35  ;;  %v4150_v50 = vld [vmem:[#allocation5 + $0x4ac] sm:$0xf] }
  0xd8   : > { %v1600_v36 = vadd.f32 %v1599_v32, %v4779_v26  ;;  %v2962_v9 = vor.u32 %v4002_v59, %v2959_v61  ;;  %v4118_v32 = vld [vmem:[#allocation5 + $0x3ac] sm:$0xf] }
  0xd9   : > { %v1618_v37 = vpop.f32.mrf.mxu1  ;;  %1995 = vmatpush.bf16.msrb.mxu1 %v2978_v57  ;;  %v3551_v57 = vld [vmem:[#allocation5 + $0x4b8] sm:$0xf0] }
  0xda   : > { %1901 = vmatpush.bf16.msra.mxu0 %v3214_v8  ;;  %v1619_v45 = vadd.f32 %v1618_v37, %v1600_v36  ;;  %v3087_v8 = vld [vmem:[#allocation5 + $0x118] sm:$0xf0]  ;;  %v3570_v36 = vor.u32 %v4154_v22, %v3567_v23 }
  0xdb   : > { %1958 = vmatpush.bf16.msra.mxu3 %v3598_v10  ;;  %2013 = vmatpush.bf16.msrb.mxu2 %v3122_v44  ;;  %v4122_v10 = vld [vmem:[#allocation5 + $0x3cc] sm:$0xf]  ;;  %v3090_v27 = vor.u32 %v4034_v7, %v3087_v8  ;;  %v3423_v37 = vld [vmem:[#allocation5 + $0x3b8] sm:$0xf0] }
  0xdc   : > { %1921 = vmatmul.bf16.vlgmr.msra.gmra.mxu1 %v4698_v56  ;;  %v3442_v21 = vor.u32 %v4122_v10, %v3439_v17  ;;  %v3231_v44 = vld [vmem:[#allocation5 + $0x238] sm:$0xf0]  ;;  %v4178_v17 = vld [vmem:[#allocation5 + $0x58c] sm:$0xf] }
  0xdd   : > { %1902 = vmatmul.bf16.vlgmr.msra.gmra.mxu0 %v4696_v53  ;;  %1996 = vmatpush.bf16.msrb.mxu1 %v2962_v9  ;;  %v3234_v7 = vor.u32 %v4070_v42, %v3231_v44  ;;  %v3215_v8 = vld [vmem:[#allocation5 + $0x218] sm:$0xf0]  ;;  %v4194_v9 = vld [vmem:[#allocation5 + $0x60c] sm:$0xf] }
  0xde   : > { %1977 = vmatpush.bf16.msrb.mxu0 %v3726_v11  ;;  %1940 = vmatmul.bf16.vlgmr.msra.gmra.mxu2 %v4730_v47  ;;  %v3727_v10 = vld [vmem:[#allocation5 + $0x618] sm:$0xf0]  ;;  %v3218_v22 = vor.u32 %v4066_v4, %v3215_v8  ;;  %v4134_v4 = vld [vmem:[#allocation5 + $0x42c] sm:$0xf] }
  0xdf   : > { %2027 = vmatpush.bf16.msrb.mxu3 %v3330_v14  ;;  %v1601_v13 = vpop.f32.mrf.mxu0  ;;  %v4190_v14 = vld [vmem:[#allocation5 + $0x5ec] sm:$0xf]  ;;  %2014 = vmatpush.bf16.msrb.mxu2 %v3106_v5  ;;  %v3410_v5 = vor.u32 %v4114_v58, %v3407_v1 }
  0xe0   : > { %1959 = vmatmul.bf16.vlgmr.msra.gmra.mxu3 %v4732_v49  ;;  %v1637_v6 = vpop.f32.mrf.mxu2  ;;  %v1602_v18 = vadd.f32 %v1601_v13, %v4779_v26  ;;  %v3714_v31 = vor.u32 %v4190_v14, %v3711_v15  ;;  %v4146_v14 = vld [vmem:[#allocation5 + $0x48c] sm:$0xf]  ;;  %v3535_v15 = vld [vmem:[#allocation5 + $0x498] sm:$0xf0] }
  0xe1   : > { %v1638_v11 = vadd.f32 %v1637_v6, %v1619_v45  ;;  %v1656_v12 = vpop.f32.mrf.mxu3  ;;  %v1620_v19 = vpop.f32.mrf.mxu1  ;;  %2065 = vmatpush.bf16.msra.mxu1 %v3586_v16  ;;  %v4110_v16 = vld [vmem:[#allocation5 + $0x36c] sm:$0xf]  ;;  %v3538_v23 = vor.u32 %v4146_v14, %v3535_v15 }
  0xe2   : > { %2046 = vmatpush.bf16.msra.mxu0 %v3458_v63  ;;  %v1621_v28 = vadd.f32 %v1620_v19, %v1602_v18  ;;  %v4182_v63 = vld [vmem:[#allocation5 + $0x5ac] sm:$0xf]  ;;  %v3663_v18 = vld [vmem:[#allocation5 + $0x598] sm:$0xf0] }
  0xe3   : > { %2028 = vmatpush.bf16.msrb.mxu3 %v3314_v24  ;;  %v4787_v24 = vadd.f32 %v1656_v12, %v1638_v11  ;;  %2015 = vmatpush.bf16.msrb.mxu2 %v3090_v27  ;;  %v3554_v11 = vor.u32 %v4150_v50, %v3551_v57  ;;  %v3682_v13 = vor.u32 %v4182_v63, %v3679_v0  ;;  %v3391_v19 = vld [vmem:[#allocation5 + $0x378] sm:$0xf0]  ;;  %v4138_v58 = vld [vmem:[#allocation5 + $0x44c] sm:$0xf] }
  0xe4   : > { %v3730_v27 = vor.u32 %v4194_v9, %v3727_v10  ;;  %v3631_v63 = vld [vmem:[#allocation5 + $0x558] sm:$0xf0]  ;;  %v4166_v10 = vld [vmem:[#allocation5 + $0x52c] sm:$0xf] }
  0xe5   : > { %2066 = vmatpush.bf16.msra.mxu1 %v3570_v36  ;;  %v4174_v36 = vld [vmem:[#allocation5 + $0x56c] sm:$0xf]  ;;  %v3359_v0 = vld [vmem:[#allocation5 + $0x338] sm:$0xf0] }
  0xe6   : > { %2047 = vmatpush.bf16.msra.mxu0 %v3442_v21  ;;  %v3394_v21 = vor.u32 %v4110_v16, %v3391_v19 }
  0xe7   : > { %2029 = vmatpush.bf16.msrb.mxu3 %v3298_v38  ;;  %v3426_v38 = vor.u32 %v4118_v32, %v3423_v37  ;;  %2084 = vmatpush.bf16.msra.mxu2 %v3714_v31  ;;  %v4106_v31 = vld [vmem:[#allocation5 + $0x34c] sm:$0xf]  ;;  %v3647_v37 = vld [vmem:[#allocation5 + $0x578] sm:$0xf0] }
  0xe8   : > { %v1639_v45 = vpop.f32.mrf.mxu2  ;;  %v1604_v62 = vpop.f32.mrf.mxu0  ;;  %v3650_v57 = vor.u32 %v4174_v36, %v3647_v37 }
  0xe9   : > { %v1640_v59 = vadd.f32 %v1639_v45, %v1621_v28  ;;  %v1658_v61 = vpop.f32.mrf.mxu3  ;;  %v1623_v3 = vpop.f32.mrf.mxu1  ;;  %2067 = vmatpush.bf16.msra.mxu1 %v3554_v11  ;;  %v3666_v28 = vor.u32 %v4178_v17, %v3663_v18  ;;  %v3615_v11 = vld [vmem:[#allocation5 + $0x538] sm:$0xf0]  ;;  %v4130_v18 = vld [vmem:[#allocation5 + $0x40c] sm:$0xf] }
  0xea   : > { %2048 = vmatpush.bf16.msra.mxu0 %v3426_v38  ;;  %v3375_v38 = vld [vmem:[#allocation5 + $0x358] sm:$0xf0]  ;;  %v3618_v19 = vor.u32 %v4166_v10, %v3615_v11 }
  0xeb   : > { %2030 = vmatpush.bf16.msrb.mxu3 %v3282_v2  ;;  %v1605_v2 = vadd.f32 %v1604_v62, %v4779_v26  ;;  %v4790_v6 = vadd.f32 %v1658_v61, %v1640_v59  ;;  %2085 = vmatpush.bf16.msra.mxu2 %v3698_v46  ;;  %v3378_v44 = vor.u32 %v4106_v31, %v3375_v38  ;;  %v3503_v59 = vld [vmem:[#allocation5 + $0x458] sm:$0xf0]  ;;  %v4102_v61 = vld [vmem:[#allocation5 + $0x32c] sm:$0xf] }
  0xec   : > { %1926 = vmatmul.bf16.gmra.mxu1 %v4718_v43  ;;  %v3522_v46 = vor.u32 %v4142_v29, %v3519_v30  ;;  %v4170_v62 = vld [vmem:[#allocation5 + $0x54c] sm:$0xf]  ;;  %v3362_v1 = vor.u32 %v4102_v61, %v3359_v0 }
  0xed   : > { %v1624_v12 = vadd.f32 %v1623_v3, %v1605_v2  ;;  %1907 = vmatmul.bf16.gmra.mxu0 %v4716_v40  ;;  %2068 = vmatpush.bf16.msra.mxu1 %v3538_v23  ;;  %v3634_v3 = vor.u32 %v4170_v62, %v3631_v63  ;;  %v4212_v23 = vld [vmem:[#allocation8 + $0x74] sm:$0xf0] }
  0xee   : > { %2049 = vmatpush.bf16.msra.mxu0 %v3410_v5  ;;  %1945 = vmatmul.bf16.gmra.mxu2 %v4747_v51  ;;  %v3487_v5 = vld [vmem:[#allocation5 + $0x438] sm:$0xf0] }
  0xef   : > { %2031 = vmatpush.bf16.msrb.mxu3 %v3266_v25  ;;  %2086 = vmatpush.bf16.msra.mxu2 %v3682_v13  ;;  %v3490_v16 = vor.u32 %v4134_v4, %v3487_v5  ;;  %v3861_v4 = vld [vmem:[#allocation8 + $0xf0] sm:$0xf]  ;;  %v4228_v5 = vld [vmem:[#allocation8 + $0xf4] sm:$0xf0] }
  0xf0   : > { %1964 = vmatmul.bf16.gmra.mxu3 %v4749_v54  ;;  %v1642_v25 = vpop.f32.mrf.mxu2  ;;  %v1606_v35 = vpop.f32.mrf.mxu0 }
  0xf1   : > { %v1643_v32 = vadd.f32 %v1642_v25, %v1624_v12  ;;  %v1661_v33 = vpop.f32.mrf.mxu3  ;;  %v1625_v42 = vpop.f32.mrf.mxu1  ;;  %2069 = vmatpush.bf16.msra.mxu1 %v3522_v46  ;;  %v3343_v12 = vld [vmem:[#allocation5 + $0x318] sm:$0xf0]  ;;  %v4162_v25 = vld [vmem:[#allocation5 + $0x50c] sm:$0xf] }
  0xf2   : > { %2050 = vmatpush.bf16.msra.mxu0 %v3394_v21  ;;  %v3471_v21 = vld [vmem:[#allocation5 + $0x418] sm:$0xf0] }
  0xf3   : > { %2032 = vmatpush.bf16.msrb.mxu3 %v3250_v41  ;;  %v1607_v41 = vadd.f32 %v1606_v35, %v4779_v26  ;;  %v4797_v45 = vadd.f32 %v1661_v33, %v1643_v32  ;;  %2087 = vmatpush.bf16.msra.mxu2 %v3666_v28  ;;  %v3506_v26 = vor.u32 %v4138_v58, %v3503_v59  ;;  %v3789_v32 = vld [vmem:[#allocation8 + $0x60] sm:$0xf]  ;;  %v4210_v33 = vld [vmem:[#allocation8 + $0x64] sm:$0xf0] }
  0xf4   : > { %v3474_v29 = vor.u32 %v4130_v18, %v3471_v21  ;;  %v4226_v18 = vld [vmem:[#allocation8 + $0xe4] sm:$0xf0] }
  0xf5   : > { %v1626_v50 = vadd.f32 %v1625_v42, %v1607_v41  ;;  %2070 = vmatpush.bf16.msra.mxu1 %v3506_v26  ;;  %v3781_v41 = vld [vmem:[#allocation8 + $0x50] sm:$0xf]  ;;  %v4208_v42 = vld [vmem:[#allocation8 + $0x54] sm:$0xf0] }
  0xf6   : > { %2051 = vmatpush.bf16.msra.mxu0 %v3378_v44 }
  0xf7   : > { %2033 = vmatpush.bf16.msrb.mxu3 %v3234_v7  ;;  %2088 = vmatpush.bf16.msra.mxu2 %v3650_v57  ;;  %v4098_v7 = vld [vmem:[#allocation5 + $0x30c] sm:$0xf] }
  0xf8   : > { %v1644_v2 = vpop.f32.mrf.mxu2  ;;  %v3346_v17 = vor.u32 %v4098_v7, %v3343_v12  ;;  %v4206_v57 = vld [vmem:[#allocation8 + $0x44] sm:$0xf0]  ;;  %v3757_v12 = vld [vmem:[#allocation8 + $0x20] sm:$0xf] }
  0xf9   : > { %v1645_v8 = vadd.f32 %v1644_v2, %v1626_v50  ;;  %v1663_v9 = vpop.f32.mrf.mxu3  ;;  %v1694_v14 = vpop.f32.mrf.mxu1  ;;  %2071 = vmatpush.bf16.msra.mxu1 %v3490_v16  ;;  %v3773_v50 = vld [vmem:[#allocation8 + $0x40] sm:$0xf]  ;;  %v4204_v2 = vld [vmem:[#allocation8 + $0x34] sm:$0xf0] }
  0xfa   : > { %2052 = vmatpush.bf16.msra.mxu0 %v3362_v1  ;;  %v1675_v13 = vpop.f32.mrf.mxu0  ;;  %v3774_v61 = vor.u32 %v4206_v57, %v3773_v50  ;;  %v4220_v50 = vld [vmem:[#allocation8 + $0xb4] sm:$0xf0] }
  0xfb   : > { %2034 = vmatpush.bf16.msrb.mxu3 %v3218_v22  ;;  %v4799_v15 = vadd.f32 %v1663_v9, %v1645_v8  ;;  %2089 = vmatpush.bf16.msra.mxu2 %v3634_v3  ;;  %v3797_v22 = vld [vmem:[#allocation8 + $0x70] sm:$0xf]  ;;  %v1676_v30 = vadd.f32 %v1675_v13, %v4787_v24  ;;  %v3782_v24 = vor.u32 %v4208_v42, %v3781_v41  ;;  %v4202_v13 = vld [vmem:[#allocation8 + $0x24] sm:$0xf0] }
  0xfc   : > { %1997 = vmatmul.bf16.vlgmr.msrb.gmra.mxu1 %v4692_v48  ;;  %v3798_v28 = vor.u32 %v4212_v23, %v3797_v22  ;;  %v3790_v48 = vor.u32 %v4210_v33, %v3789_v32  ;;  %v3862_v9 = vor.u32 %v4228_v5, %v3861_v4  ;;  %v3749_v23 = vld [vmem:[#allocation8 + $0x10] sm:$0xf]  ;;  %v3741_v32 = vld [vmem:[#allocation8] sm:$0xf]  ;;  %v4198_v33 = vld [vmem:[#allocation8 + $0x4] sm:$0xf0] }
  0xfd   : > { %3735 = vmatmul.msk.bf16.vlgmr.msrb.gmra.mxu0 %vm1583_vm0, %v4734_v55  ;;  %2072 = vmatpush.bf16.msra.mxu1 %v3474_v29  ;;  %v3791_v4 = vld [vmem:[#allocation8 + $0x68] sm:$0xf0] }
  0xfe   : > { %2016 = vmatmul.bf16.vlgmr.msrb.gmra.mxu2 %v4694_v52  ;;  %2053 = vmatpush.bf16.msra.mxu0 %v3346_v17  ;;  %v1695_v52 = vadd.f32 %v1694_v14, %v1676_v30  ;;  %v3853_v14 = vld [vmem:[#allocation8 + $0xe0] sm:$0xf]  ;;  %v3758_v17 = vor.u32 %v4202_v13, %v3757_v12  ;;  %v3783_v12 = vld [vmem:[#allocation8 + $0x58] sm:$0xf0] }
  0xff   : > { %2110 = vmatpush.bf16.msra.mxu3 %v3730_v27  ;;  %v3599_v27 = vld [vmem:[#allocation5 + $0x518] sm:$0xf0]  ;;  %2090 = vmatpush.bf16.msra.mxu2 %v3618_v19 }
 0x100   : > { %2035 = vmatmul.bf16.vlgmr.msrb.gmra.mxu3 %v4696_v53  ;;  %v3602_v31 = vor.u32 %v4162_v25, %v3599_v27  ;;  %v3845_v27 = vld [vmem:[#allocation8 + $0xd0] sm:$0xf] }
 0x101   : > { %v1713_v35 = vpop.f32.mrf.mxu2  ;;  %v1696_v38 = vpop.f32.mrf.mxu1  ;;  %2571 = vmatpush.bf16.msrb.mxu1 %v3862_v9  ;;  %v4207_v9 = vld [vmem:[#allocation8 + $0x54] sm:$0xf] }
 0x102   : > { %2552 = vmatpush.bf16.msrb.mxu0 %v3798_v28  ;;  %v1677_v37 = vpop.f32.mrf.mxu0  ;;  %v1714_v44 = vadd.f32 %v1713_v35, %v1695_v52  ;;  %v4224_v28 = vld [vmem:[#allocation8 + $0xd4] sm:$0xf0]  ;;  %v3837_v35 = vld [vmem:[#allocation8 + $0xc0] sm:$0xf]  ;;  %v3786_v13 = vor.u32 %v4207_v9, %v3783_v12 }
 0x103   : > { %v4807_v36 = vpop.f32.mrf.mxu3  ;;  %v1678_v53 = vadd.f32 %v1677_v37, %v4790_v6  ;;  %2091 = vmatpush.bf16.msra.mxu2 %v3602_v31  ;;  %v3765_v6 = vld [vmem:[#allocation8 + $0x30] sm:$0xf]  ;;  %v3846_v30 = vor.u32 %v4224_v28, %v3845_v27  ;;  %v3767_v27 = vld [vmem:[#allocation8 + $0x38] sm:$0xf0]  ;;  %v4227_v28 = vld [vmem:[#allocation8 + $0xf4] sm:$0xf] }
 0x104   : > { %v2122_v62 = vmul.f32 0.2, %v1714_v44  ;;  %v3766_v3 = vor.u32 %v4204_v2, %v3765_v6 }
 0x105   : > { %v1697_v46 = vadd.f32 %v1696_v38, %v1678_v53  ;;  %v3742_v38 = vor.u32 %v4198_v33, %v3741_v32  ;;  %v4201_v33 = vld [vmem:[#allocation8 + $0x24] sm:$0xf] }
 0x106   : > { %2553 = vmatpush.bf16.msrb.mxu0 %v3790_v48  ;;  %v2138_v7 = vmax.f32 %v1714_v44, %v2122_v62 }
 0x109   : > { %v1715_v58 = vpop.f32.mrf.mxu2  ;;  %v1699_v1 = vpop.f32.mrf.mxu1 }
 0x10a   : > { %2554 = vmatpush.bf16.msrb.mxu0 %v3782_v24  ;;  %v1716_v63 = vadd.f32 %v1715_v58, %v1697_v46  ;;  %v1680_v0 = vpop.f32.mrf.mxu0  ;;  %v3829_v46 = vld [vmem:[#allocation8 + $0xb0] sm:$0xf]  ;;  %v4211_v58 = vld [vmem:[#allocation8 + $0x74] sm:$0xf] }
 0x10b   : > { %v4810_v59 = vpop.f32.mrf.mxu3  ;;  %v1681_v11 = vadd.f32 %v1680_v0, %v4797_v45  ;;  %v4200_v45 = vld [vmem:[#allocation8 + $0x14] sm:$0xf0]  ;;  %v3830_v57 = vor.u32 %v4220_v50, %v3829_v46 }
 0x10c   : > { %v2126_v26 = vmul.f32 0.2, %v1716_v63  ;;  %2002 = vmatmul.bf16.gmra.mxu1 %v4712_v34  ;;  %v3750_v25 = vor.u32 %v4200_v45, %v3749_v23  ;;  %v4851_v45 = vperm.slane %v4776_v20, 1 }
 0x10d   : > { %3736 = vmatmul.msk.bf16.gmra.mxu0 %vm1583_vm0, %v4751_v60  ;;  %v1700_v22 = vadd.f32 %v1699_v1, %v1681_v11  ;;  %v3821_v1 = vld [vmem:[#allocation8 + $0xa0] sm:$0xf] }
 0x10e   : > { %2555 = vmatpush.bf16.msrb.mxu0 %v3774_v61  ;;  %v2142_v8 = vmax.f32 %v1716_v63, %v2126_v26  ;;  %2021 = vmatmul.bf16.gmra.mxu2 %v4714_v39  ;;  %v3854_v39 = vor.u32 %v4226_v18, %v3853_v14  ;;  %v3799_v61 = vld [vmem:[#allocation8 + $0x78] sm:$0xf0]  ;;  %v4218_v26 = vld [vmem:[#allocation8 + $0xa4] sm:$0xf0]  ;;  %v3805_v14 = vld [vmem:[#allocation8 + $0x80] sm:$0xf]  ;;  %v1733_v32 = vadd.f32 %v4807_v36, %v4851_v45 }
 0x10f   : > { %v3802_v0 = vor.u32 %v4211_v58, %v3799_v61  ;;  %v3822_v2 = vor.u32 %v4218_v26, %v3821_v1  ;;  %v3751_v36 = vld [vmem:[#allocation8 + $0x18] sm:$0xf0]  ;;  %v1735_v46 = vadd.f32 %v4810_v59, %v4851_v45  ;;  %v4221_v1 = vld [vmem:[#allocation8 + $0xc4] sm:$0xf] }
 0x110   : > { %2040 = vmatmul.bf16.gmra.mxu3 %v4716_v40  ;;  %v4817_v10 = vpack.c.bf16 %v2142_v8, %v2138_v7  ;;  %2572 = vmatpush.bf16.msrb.mxu1 %v3854_v39  ;;  %v4216_v8 = vld [vmem:[#allocation8 + $0x94] sm:$0xf0]  ;;  %v3775_v39 = vld [vmem:[#allocation8 + $0x48] sm:$0xf0] }
 0x111   : > { %v1718_v34 = vpop.f32.mrf.mxu2  ;;  %v1701_v21 = vpop.f32.mrf.mxu1 }
 0x112   : > { %2556 = vmatpush.bf16.msrb.mxu0 %v3766_v3  ;;  %v1682_v19 = vpop.f32.mrf.mxu0  ;;  %v1719_v29 = vadd.f32 %v1718_v34, %v1700_v22  ;;  %v4209_v3 = vld [vmem:[#allocation8 + $0x64] sm:$0xf]  ;;  %v4214_v34 = vld [vmem:[#allocation8 + $0x84] sm:$0xf0] }
 0x113   : > { %v4820_v16 = vpop.f32.mrf.mxu3  ;;  %v1683_v40 = vadd.f32 %v1682_v19, %v4799_v15  ;;  %v4222_v15 = vld [vmem:[#allocation8 + $0xc4] sm:$0xf0] }
 0x114   : > { %2573 = vmatpush.bf16.msrb.mxu1 %v3846_v30  ;;  %v2130_v52 = vmul.f32 0.2, %v1719_v29  ;;  %v3838_v24 = vor.u32 %v4222_v15, %v3837_v35  ;;  %v3863_v30 = vld [vmem:[#allocation8 + $0xf8] sm:$0xf0]  ;;  %v3759_v35 = vld [vmem:[#allocation8 + $0x28] sm:$0xf0] }
 0x115   : > { %v1702_v31 = vadd.f32 %v1701_v21, %v1683_v40  ;;  %v3806_v21 = vor.u32 %v4214_v34, %v3805_v14  ;;  %v3762_v15 = vor.u32 %v4201_v33, %v3759_v35  ;;  %v4217_v14 = vld [vmem:[#allocation8 + $0xa4] sm:$0xf]  ;;  %v3823_v34 = vld [vmem:[#allocation8 + $0xa8] sm:$0xf0] }
 0x116   : > { %2557 = vmatpush.bf16.msrb.mxu0 %v3758_v17  ;;  %v2146_v62 = vmax.f32 %v1719_v29, %v2130_v52  ;;  %v4205_v17 = vld [vmem:[#allocation8 + $0x44] sm:$0xf]  ;;  %v3855_v52 = vld [vmem:[#allocation8 + $0xe8] sm:$0xf0] }
 0x117   : > { %v3778_v23 = vor.u32 %v4205_v17, %v3775_v39 }
 0x118   : > { %2574 = vmatpush.bf16.msrb.mxu1 %v3838_v24  ;;  %v4199_v24 = vld [vmem:[#allocation8 + $0x14] sm:$0xf] }
 0x119   : > { %v1720_v48 = vpop.f32.mrf.mxu2  ;;  %v4827_v42 = vpop.f32.mrf.mxu1 }
 0x11a   : > { %2558 = vmatpush.bf16.msrb.mxu0 %v3750_v25  ;;  %v1721_v53 = vadd.f32 %v1720_v48, %v1702_v31  ;;  %v4825_v41 = vpop.f32.mrf.mxu0  ;;  %v4203_v25 = vld [vmem:[#allocation8 + $0x34] sm:$0xf]  ;;  %v3866_v31 = vor.u32 %v4227_v28, %v3863_v30  ;;  %v4225_v48 = vld [vmem:[#allocation8 + $0xe4] sm:$0xf] }
 0x11b   : > { %v4823_v37 = vpop.f32.mrf.mxu3  ;;  %v3770_v29 = vor.u32 %v4203_v25, %v3767_v27 }
 0x11c   : > { %v2134_v44 = vmul.f32 0.2, %v1721_v53  ;;  %2073 = vmatmul.bf16.vlgmr.msra.gmra.mxu1 %v4730_v47  ;;  %v1740_v28 = vadd.f32 %v4823_v37, %v4851_v45 }
 0x11d   : > { %2054 = vmatmul.bf16.vlgmr.msra.gmra.mxu0 %v4698_v56  ;;  %2575 = vmatpush.bf16.msrb.mxu1 %v3830_v57  ;;  %v3847_v57 = vld [vmem:[#allocation8 + $0xd8] sm:$0xf0] }
 0x11e   : > { %2559 = vmatpush.bf16.msrb.mxu0 %v3742_v38  ;;  %v2150_v63 = vmax.f32 %v1721_v53, %v2134_v44  ;;  %2092 = vmatmul.bf16.vlgmr.msra.gmra.mxu2 %v4732_v49  ;;  %v3794_v49 = vor.u32 %v4209_v3, %v3791_v4  ;;  %v4223_v44 = vld [vmem:[#allocation8 + $0xd4] sm:$0xf]  ;;  %v3839_v4 = vld [vmem:[#allocation8 + $0xc8] sm:$0xf0] }
 0x11f   : > { %v3850_v58 = vor.u32 %v4223_v44, %v3847_v57  ;;  %v3925_v44 = vld [vmem:[#allocation8 + $0x170] sm:$0xf] }
 0x120   : > { %3737 = vmatmul.msk.bf16.vlgmr.msra.gmra.mxu3 %vm1583_vm0, %v4734_v55  ;;  %v4834_v6 = vpack.c.bf16 %v2150_v63, %v2146_v62  ;;  %v3813_v55 = vld [vmem:[#allocation8 + $0x90] sm:$0xf]  ;;  %v4197_v63 = vld [vmem:[#allocation8 + $0x4] sm:$0xf] }
 0x121   : > { %v4836_v56 = vpop.f32.mrf.mxu2  ;;  %v4840_v7 = vpop.f32.mrf.mxu1  ;;  %2576 = vmatpush.bf16.msrb.mxu1 %v3822_v2  ;;  %v3814_v11 = vor.u32 %v4216_v8, %v3813_v55  ;;  %v3842_v55 = vor.u32 %v4221_v1, %v3839_v4  ;;  %v4240_v4 = vld [vmem:[#allocation8 + $0x154] sm:$0xf0] }
 0x122   : > { %2628 = vmatpush.bf16.msra.mxu0 %v3802_v0  ;;  %v1753_v5 = vpop.f32.mrf.mxu0  ;;  %v3743_v0 = vld [vmem:[#allocation8 + $0x8] sm:$0xf0] }
 0x123   : > { %v4838_v47 = vpop.f32.mrf.mxu3  ;;  %v1754_v62 = vadd.f32 %v1753_v5, %v1735_v46  ;;  %v3746_v3 = vor.u32 %v4197_v63, %v3743_v0  ;;  %v3831_v5 = vld [vmem:[#allocation8 + $0xb8] sm:$0xf0] }
 0x125   : > { %2577 = vmatpush.bf16.msrb.mxu1 %v3814_v11  ;;  %v1773_v8 = vadd.f32 %v4840_v7, %v1754_v62 }
 0x126   : > { %2629 = vmatpush.bf16.msra.mxu0 %v3794_v49 }
 0x129   : > { %v4842_v18 = vpop.f32.mrf.mxu2  ;;  %v4848_v40 = vpop.f32.mrf.mxu1  ;;  %2578 = vmatpush.bf16.msrb.mxu1 %v3806_v21 }
 0x12a   : > { %2630 = vmatpush.bf16.msra.mxu0 %v3786_v13  ;;  %v4846_v22 = vpop.f32.mrf.mxu0  ;;  %v1792_v9 = vadd.f32 %v4842_v18, %v1773_v8  ;;  %v1738_v13 = vadd.f32 %v4820_v16, %v4851_v45  ;;  %v3826_v18 = vor.u32 %v4217_v14, %v3823_v34  ;;  %v4215_v16 = vld [vmem:[#allocation8 + $0x94] sm:$0xf]  ;;  %v3901_v8 = vld [vmem:[#allocation8 + $0x140] sm:$0xf] }
 0x12b   : > { %v4844_v19 = vpop.f32.mrf.mxu3 }
 0x12c   : > { %2078 = vmatmul.bf16.gmra.mxu1 %v4747_v51  ;;  %v1757_v7 = vadd.f32 %v4846_v22, %v1738_v13 }
 0x12d   : > { %2059 = vmatmul.bf16.gmra.mxu0 %v4718_v43  ;;  %2647 = vmatpush.bf16.msra.mxu1 %v3866_v31  ;;  %v1752_v43 = vadd.f32 %v4825_v41, %v1733_v32  ;;  %v3754_v41 = vor.u32 %v4199_v24, %v3751_v36 }
 0x12e   : > { %2631 = vmatpush.bf16.msra.mxu0 %v3778_v23  ;;  %2097 = vmatmul.bf16.gmra.mxu2 %v4749_v54  ;;  %v1776_v30 = vadd.f32 %v4848_v40, %v1757_v7  ;;  %v4244_v40 = vld [vmem:[#allocation8 + $0x174] sm:$0xf0] }
 0x12f   : > { %v1771_v50 = vadd.f32 %v4827_v42, %v1752_v43  ;;  %v3807_v43 = vld [vmem:[#allocation8 + $0x88] sm:$0xf0]  ;;  %v4236_v7 = vld [vmem:[#allocation8 + $0x134] sm:$0xf0] }
 0x130   : > { %3738 = vmatmul.msk.bf16.gmra.mxu3 %vm1583_vm0, %v4751_v60  ;;  %v3858_v60 = vor.u32 %v4225_v48, %v3855_v52  ;;  %v4213_v48 = vld [vmem:[#allocation8 + $0x84] sm:$0xf] }
 0x131   : > { %v1794_v38 = vpop.f32.mrf.mxu2  ;;  %v4863_v53 = vpop.f32.mrf.mxu1  ;;  %v1790_v61 = vadd.f32 %v4836_v56, %v1771_v50  ;;  %v4219_v56 = vld [vmem:[#allocation8 + $0xb4] sm:$0xf]  ;;  %v3810_v37 = vor.u32 %v4213_v48, %v3807_v43  ;;  %v3926_v50 = vor.u32 %v4244_v40, %v3925_v44  ;;  %v4912_v48 = vperm.slane %v4776_v20, 2  ;;  %v4241_v20 = vld [vmem:[#allocation8 + $0x164] sm:$0xf] }
 0x132   : > { %2632 = vmatpush.bf16.msra.mxu0 %v3770_v29  ;;  %v1758_v54 = vpop.f32.mrf.mxu0  ;;  %2648 = vmatpush.bf16.msra.mxu1 %v3858_v60  ;;  %v3834_v12 = vor.u32 %v4219_v56, %v3831_v5  ;;  %v3815_v29 = vld [vmem:[#allocation8 + $0x98] sm:$0xf0]  ;;  %v1795_v32 = vadd.f32 %v1794_v38, %v1776_v30  ;;  %v4238_v56 = vld [vmem:[#allocation8 + $0x144] sm:$0xf0]  ;;  %v3919_v40 = vld [vmem:[#allocation8 + $0x168] sm:$0xf0] }
 0x133   : > { %v4861_v51 = vpop.f32.mrf.mxu3  ;;  %v1809_v42 = vadd.f32 %v4838_v47, %v1790_v61  ;;  %v1811_v47 = vadd.f32 %v4844_v19, %v1792_v9  ;;  %v3818_v22 = vor.u32 %v4215_v16, %v3815_v29  ;;  %v1759_v33 = vadd.f32 %v1758_v54, %v1740_v28  ;;  %2590 = vmatpush.bf16.msrb.mxu2 %v3926_v50  ;;  %v4242_v61 = vld [vmem:[#allocation8 + $0x164] sm:$0xf0] }
 0x134   : > { %v1814_v46 = vadd.f32 %v4861_v51, %v1795_v32  ;;  %v3902_v9 = vor.u32 %v4238_v56, %v3901_v8  ;;  %v3869_v32 = vld [vmem:[#allocation8 + $0x100] sm:$0xf] }
 0x135   : > { %v1778_v38 = vadd.f32 %v4863_v53, %v1759_v33  ;;  %v4230_v33 = vld [vmem:[#allocation8 + $0x104] sm:$0xf0] }
 0x136   : > { %2633 = vmatpush.bf16.msra.mxu0 %v3762_v15  ;;  %2649 = vmatpush.bf16.msra.mxu1 %v3850_v58  ;;  %v3917_v58 = vld [vmem:[#allocation8 + $0x160] sm:$0xf] }
 0x137   : > { %v3918_v62 = vor.u32 %v4242_v61, %v3917_v58  ;;  %v4239_v61 = vld [vmem:[#allocation8 + $0x154] sm:$0xf] }
 0x139   : > { %v1796_v26 = vpop.f32.mrf.mxu2  ;;  %v1846_v59 = vpop.f32.mrf.mxu1  ;;  %2591 = vmatpush.bf16.msrb.mxu2 %v3918_v62 }
 0x13a   : > { %2634 = vmatpush.bf16.msra.mxu0 %v3754_v41  ;;  %v1827_v49 = vpop.f32.mrf.mxu0  ;;  %2650 = vmatpush.bf16.msra.mxu1 %v3842_v55  ;;  %v1797_v41 = vadd.f32 %v1796_v26, %v1778_v38  ;;  %v3909_v26 = vld [vmem:[#allocation8 + $0x150] sm:$0xf] }
 0x13b   : > { %v4869_v2 = vpop.f32.mrf.mxu3  ;;  %v1828_v11 = vadd.f32 %v1827_v49, %v1809_v42 }
 0x13c   : > { %v1816_v63 = vadd.f32 %v4869_v2, %v1797_v41 }
 0x13d   : > { %2560 = vmatmul.bf16.vlgmr.msrb.gmra.mxu0 %v4817_v10  ;;  %v1847_v17 = vadd.f32 %v1846_v59, %v1828_v11  ;;  %v3910_v59 = vor.u32 %v4240_v4, %v3909_v26  ;;  %v4237_v26 = vld [vmem:[#allocation8 + $0x144] sm:$0xf] }
 0x13e   : > { %2635 = vmatpush.bf16.msra.mxu0 %v3746_v3  ;;  %2651 = vmatpush.bf16.msra.mxu1 %v3834_v12 }
 0x13f   : > { %v2123_v19 = vmul.f32 0.2, %v1847_v17  ;;  %2592 = vmatpush.bf16.msrb.mxu2 %v3910_v59 }
 0x141   : > { %v4879_v21 = vpop.f32.mrf.mxu2  ;;  %v1848_v25 = vpop.f32.mrf.mxu1  ;;  %v2139_v15 = vmax.f32 %v1847_v17, %v2123_v19  ;;  %v3877_v19 = vld [vmem:[#allocation8 + $0x110] sm:$0xf] }
 0x142   : > { %v1829_v23 = vpop.f32.mrf.mxu0  ;;  %2652 = vmatpush.bf16.msra.mxu1 %v3826_v18  ;;  %v1866_v44 = vadd.f32 %v4879_v21, %v4912_v48 }
 0x143   : > { %v4881_v39 = vpop.f32.mrf.mxu3  ;;  %v1830_v27 = vadd.f32 %v1829_v23, %v1811_v47  ;;  %2593 = vmatpush.bf16.msrb.mxu2 %v3902_v9  ;;  %v3893_v47 = vld [vmem:[#allocation8 + $0x130] sm:$0xf]  ;;  %v3885_v23 = vld [vmem:[#allocation8 + $0x120] sm:$0xf] }
 0x144   : > { %v3894_v18 = vor.u32 %v4236_v7, %v3893_v47  ;;  %v1885_v38 = vadd.f32 %v4881_v39, %v1866_v44  ;;  %v4252_v44 = vld [vmem:[#allocation8 + $0x1b4] sm:$0xf0] }
 0x145   : > { %v1849_v31 = vadd.f32 %v1848_v25, %v1830_v27  ;;  %v4234_v25 = vld [vmem:[#allocation8 + $0x124] sm:$0xf0] }
 0x146   : > { %2653 = vmatpush.bf16.msra.mxu1 %v3818_v22  ;;  %v3886_v27 = vor.u32 %v4234_v25, %v3885_v23 }
 0x147   : > { %v2127_v35 = vmul.f32 0.2, %v1849_v31  ;;  %2594 = vmatpush.bf16.msrb.mxu2 %v3894_v18 }
 0x149   : > { %v2143_v52 = vmax.f32 %v1849_v31, %v2127_v35  ;;  %v4886_v60 = vpop.f32.mrf.mxu2  ;;  %v1851_v36 = vpop.f32.mrf.mxu1  ;;  %v4232_v31 = vld [vmem:[#allocation8 + $0x114] sm:$0xf0]  ;;  %v3870_v35 = vor.u32 %v4230_v33, %v3869_v32 }
 0x14a   : > { %v1832_v45 = vpop.f32.mrf.mxu0  ;;  %2654 = vmatpush.bf16.msra.mxu1 %v3810_v37  ;;  %v3878_v22 = vor.u32 %v4232_v31, %v3877_v19  ;;  %v4243_v37 = vld [vmem:[#allocation8 + $0x174] sm:$0xf]  ;;  %v1868_v50 = vadd.f32 %v4886_v60, %v4912_v48  ;;  %v3981_v60 = vld [vmem:[#allocation8 + $0x1e0] sm:$0xf]  ;;  %v4233_v31 = vld [vmem:[#allocation8 + $0x124] sm:$0xf] }
 0x14b   : > { %v4888_v24 = vpop.f32.mrf.mxu3  ;;  %v4892_v54 = vpack.c.bf16 %v2143_v52, %v2139_v15  ;;  %v1833_v57 = vadd.f32 %v1832_v45, %v1814_v46  ;;  %2595 = vmatpush.bf16.msrb.mxu2 %v3886_v27  ;;  %v3927_v45 = vld [vmem:[#allocation8 + $0x178] sm:$0xf0]  ;;  %v3922_v46 = vor.u32 %v4241_v20, %v3919_v40  ;;  %v4231_v20 = vld [vmem:[#allocation8 + $0x114] sm:$0xf] }
 0x14c   : > { %v1887_v39 = vadd.f32 %v4888_v24, %v1868_v50  ;;  %v3973_v24 = vld [vmem:[#allocation8 + $0x1d0] sm:$0xf] }
 0x14d   : > { %2565 = vmatmul.bf16.gmra.mxu0 %v4834_v6  ;;  %2579 = vmatmul.bf16.vlgmr.msrb.gmra.mxu1 %v4892_v54  ;;  %v1852_v0 = vadd.f32 %v1851_v36, %v1833_v57  ;;  %v3930_v36 = vor.u32 %v4243_v37, %v3927_v45 }
 0x14f   : > { %v2131_v55 = vmul.f32 0.2, %v1852_v0  ;;  %2596 = vmatpush.bf16.msrb.mxu2 %v3878_v22  ;;  %v3887_v22 = vld [vmem:[#allocation8 + $0x128] sm:$0xf0] }
 0x151   : > { %v4897_v51 = vpop.f32.mrf.mxu2  ;;  %v1853_v3 = vpop.f32.mrf.mxu1  ;;  %v2147_v2 = vmax.f32 %v1852_v0, %v2131_v55  ;;  %v3911_v0 = vld [vmem:[#allocation8 + $0x158] sm:$0xf0]  ;;  %v3903_v55 = vld [vmem:[#allocation8 + $0x148] sm:$0xf0] }
 0x152   : > { %v1834_v1 = vpop.f32.mrf.mxu0  ;;  %v1871_v18 = vadd.f32 %v4897_v51, %v4912_v48 }
 0x153   : > { %v4899_v53 = vpop.f32.mrf.mxu3  ;;  %v1835_v49 = vadd.f32 %v1834_v1, %v1816_v63  ;;  %2597 = vmatpush.bf16.msrb.mxu2 %v3870_v35  ;;  %v3914_v1 = vor.u32 %v4239_v61, %v3911_v0 }
 0x154   : > { %v1890_v33 = vadd.f32 %v4899_v53, %v1871_v18 }
 0x155   : > { %v1854_v42 = vadd.f32 %v1853_v3, %v1835_v49  ;;  %v4258_v3 = vld [vmem:[#allocation8 + $0x1e4] sm:$0xf0] }
 0x156   : > { %v3982_v59 = vor.u32 %v4258_v3, %v3981_v60 }
 0x157   : > { %v2135_v5 = vmul.f32 0.2, %v1854_v42  ;;  %2666 = vmatpush.bf16.msra.mxu2 %v3930_v36  ;;  %v3957_v36 = vld [vmem:[#allocation8 + $0x1b0] sm:$0xf] }
 0x159   : > { %v2151_v11 = vmax.f32 %v1854_v42, %v2135_v5  ;;  %v4901_v12 = vpop.f32.mrf.mxu2  ;;  %v1922_v34 = vpop.f32.mrf.mxu1  ;;  %v3906_v42 = vor.u32 %v4237_v26, %v3903_v55 }
 0x15a   : > { %v1903_v14 = vpop.f32.mrf.mxu0  ;;  %v1873_v51 = vadd.f32 %v4901_v12, %v4912_v48  ;;  %v3879_v12 = vld [vmem:[#allocation8 + $0x118] sm:$0xf0] }
 0x15b   : > { %v4903_v13 = vpop.f32.mrf.mxu3  ;;  %v4905_v17 = vpack.c.bf16 %v2151_v11, %v2147_v2  ;;  %2667 = vmatpush.bf16.msra.mxu2 %v3922_v46  ;;  %v1904_v62 = vadd.f32 %v1903_v14, %v1885_v38  ;;  %v4256_v11 = vld [vmem:[#allocation8 + $0x1d4] sm:$0xf0]  ;;  %v4235_v14 = vld [vmem:[#allocation8 + $0x134] sm:$0xf]  ;;  %v3958_v46 = vor.u32 %v4252_v44, %v3957_v36  ;;  %v3882_v48 = vor.u32 %v4231_v20, %v3879_v12  ;;  %v3975_v20 = vld [vmem:[#allocation8 + $0x1d8] sm:$0xf0] }
 0x15c   : > { %v3974_v7 = vor.u32 %v4256_v11, %v3973_v24  ;;  %v4255_v44 = vld [vmem:[#allocation8 + $0x1d4] sm:$0xf]  ;;  %v4253_v12 = vld [vmem:[#allocation8 + $0x1c4] sm:$0xf] }
 0x15d   : > { %2584 = vmatmul.bf16.gmra.mxu1 %v4905_v17  ;;  %2636 = vmatmul.bf16.vlgmr.msra.gmra.mxu0 %v4817_v10  ;;  %v1923_v4 = vadd.f32 %v1922_v34, %v1904_v62  ;;  %v3895_v34 = vld [vmem:[#allocation8 + $0x138] sm:$0xf0] }
 0x15e   : > { %v3898_v23 = vor.u32 %v4235_v14, %v3895_v34  ;;  %v4357_v14 = vld [vmem:[#allocation7] sm:$0xf] }
 0x15f   : > { %2668 = vmatpush.bf16.msra.mxu2 %v3914_v1  ;;  %v3871_v1 = vld [vmem:[#allocation8 + $0x108] sm:$0xf0] }
 0x161   : > { %v1941_v28 = vpop.f32.mrf.mxu2  ;;  %v1924_v30 = vpop.f32.mrf.mxu1 }
 0x162   : > { %v1905_v29 = vpop.f32.mrf.mxu0  ;;  %v1942_v8 = vadd.f32 %v1941_v28, %v1923_v4  ;;  %v3965_v28 = vld [vmem:[#allocation8 + $0x1c0] sm:$0xf] }
 0x163   : > { %v4909_v16 = vpop.f32.mrf.mxu3  ;;  %v1906_v49 = vadd.f32 %v1905_v29, %v1887_v39  ;;  %2669 = vmatpush.bf16.msra.mxu2 %v3906_v42  ;;  %v4254_v29 = vld [vmem:[#allocation8 + $0x1c4] sm:$0xf0] }
 0x164   : > { %v1961_v25 = vadd.f32 %v4909_v16, %v1942_v8  ;;  %v3966_v19 = vor.u32 %v4254_v29, %v3965_v28  ;;  %v3933_v8 = vld [vmem:[#allocation8 + $0x180] sm:$0xf] }
 0x165   : > { %v1925_v47 = vadd.f32 %v1924_v30, %v1906_v49  ;;  %v3890_v30 = vor.u32 %v4233_v31, %v3887_v22  ;;  %v3941_v49 = vld [vmem:[#allocation8 + $0x190] sm:$0xf]  ;;  %v4257_v31 = vld [vmem:[#allocation8 + $0x1e4] sm:$0xf]  ;;  %v3983_v22 = vld [vmem:[#allocation8 + $0x1e8] sm:$0xf0] }
 0x167   : > { %2670 = vmatpush.bf16.msra.mxu2 %v3898_v23 }
 0x169   : > { %v1943_v10 = vpop.f32.mrf.mxu2  ;;  %v4918_v52 = vpop.f32.mrf.mxu1 }
 0x16a   : > { %v4916_v15 = vpop.f32.mrf.mxu0  ;;  %v1944_v27 = vadd.f32 %v1943_v10, %v1925_v47  ;;  %v4969_v47 = vperm.slane %v4357_v14, 3 }
 0x16b   : > { %v4914_v43 = vpop.f32.mrf.mxu3  ;;  %2671 = vmatpush.bf16.msra.mxu2 %v3890_v30  ;;  %v3986_v30 = vor.u32 %v4257_v31, %v3983_v22 }
 0x16c   : > { %v1963_v35 = vadd.f32 %v4914_v43, %v1944_v27  ;;  %v1892_v43 = vadd.f32 %v4903_v13, %v1873_v51 }
 0x16d   : > { %2641 = vmatmul.bf16.gmra.mxu0 %v4834_v6  ;;  %2655 = vmatmul.bf16.vlgmr.msra.gmra.mxu1 %v4892_v54  ;;  %v3989_v6 = vld [vmem:[#allocation8 + $0x1f0] sm:$0xf]  ;;  %v4260_v54 = vld [vmem:[#allocation8 + $0x1f4] sm:$0xf0] }
 0x16e   : > { %v3990_v63 = vor.u32 %v4260_v54, %v3989_v6  ;;  %v4250_v6 = vld [vmem:[#allocation8 + $0x1a4] sm:$0xf0]  ;;  %v4229_v54 = vld [vmem:[#allocation8 + $0x104] sm:$0xf] }
 0x16f   : > { %2672 = vmatpush.bf16.msra.mxu2 %v3882_v48  ;;  %v3874_v39 = vor.u32 %v4229_v54, %v3871_v1  ;;  %v3967_v48 = vld [vmem:[#allocation8 + $0x1c8] sm:$0xf0] }
 0x170   : > { %2609 = vmatpush.bf16.msrb.mxu3 %v3990_v63 }
 0x171   : > { %v4927_v41 = vpop.f32.mrf.mxu2  ;;  %v4933_v21 = vpop.f32.mrf.mxu1 }
 0x172   : > { %v4931_v58 = vpop.f32.mrf.mxu0 }
 0x173   : > { %v4929_v57 = vpop.f32.mrf.mxu3  ;;  %v1911_v61 = vadd.f32 %v4931_v58, %v1892_v43  ;;  %2673 = vmatpush.bf16.msra.mxu2 %v3874_v39  ;;  %v3970_v43 = vor.u32 %v4253_v12, %v3967_v48  ;;  %v4249_v39 = vld [vmem:[#allocation8 + $0x1a4] sm:$0xf] }
 0x174   : > { %2610 = vmatpush.bf16.msrb.mxu3 %v3982_v59  ;;  %v4248_v59 = vld [vmem:[#allocation8 + $0x194] sm:$0xf0] }
 0x175   : > { %v1930_v58 = vadd.f32 %v4933_v21, %v1911_v61  ;;  %v3942_v55 = vor.u32 %v4248_v59, %v3941_v49  ;;  %v4251_v61 = vld [vmem:[#allocation8 + $0x1b4] sm:$0xf] }
 0x178   : > { %2611 = vmatpush.bf16.msrb.mxu3 %v3974_v7 }
 0x179   : > { %v4936_v56 = vpop.f32.mrf.mxu2  ;;  %v4940_v2 = vpop.f32.mrf.mxu1 }
 0x17a   : > { %v1979_v9 = vpop.f32.mrf.mxu0  ;;  %v1999_v29 = vadd.f32 %v4940_v2, %v4969_v47  ;;  %v3978_v2 = vor.u32 %v4255_v44, %v3975_v20 }
 0x17b   : > { %v4938_v5 = vpop.f32.mrf.mxu3  ;;  %v1980_v32 = vadd.f32 %v1979_v9, %v1961_v25  ;;  %v4246_v9 = vld [vmem:[#allocation8 + $0x184] sm:$0xf0]  ;;  %v3991_v25 = vld [vmem:[#allocation8 + $0x1f8] sm:$0xf0] }
 0x17c   : > { %2612 = vmatpush.bf16.msrb.mxu3 %v3966_v19  ;;  %v3934_v11 = vor.u32 %v4246_v9, %v3933_v8  ;;  %v3943_v8 = vld [vmem:[#allocation8 + $0x198] sm:$0xf0] }
 0x17d   : > { %2660 = vmatmul.bf16.gmra.mxu1 %v4905_v17  ;;  %v1909_v17 = vadd.f32 %v4916_v15, %v1890_v33  ;;  %v2124_v53 = vmul.f32 0.2, %v1980_v32  ;;  %v3949_v15 = vld [vmem:[#allocation8 + $0x1a0] sm:$0xf] }
 0x17e   : > { %v3950_v0 = vor.u32 %v4250_v6, %v3949_v15 }
 0x17f   : > { %v1928_v50 = vadd.f32 %v4918_v52, %v1909_v17  ;;  %v2140_v62 = vmax.f32 %v1980_v32, %v2124_v53 }
 0x180   : > { %2613 = vmatpush.bf16.msrb.mxu3 %v3958_v46 }
 0x181   : > { %v4950_v16 = vpop.f32.mrf.mxu2  ;;  %v4955_v45 = vpop.f32.mrf.mxu1  ;;  %v1947_v60 = vadd.f32 %v4927_v41, %v1928_v50  ;;  %v1949_v41 = vadd.f32 %v4936_v56, %v1930_v58 }
 0x182   : > { %v1981_v37 = vpop.f32.mrf.mxu0  ;;  %v2018_v33 = vadd.f32 %v4950_v16, %v1999_v29 }
 0x183   : > { %v4952_v10 = vpop.f32.mrf.mxu3  ;;  %v1982_v40 = vadd.f32 %v1981_v37, %v1963_v35  ;;  %v1966_v42 = vadd.f32 %v4929_v57, %v1947_v60  ;;  %v1968_v7 = vadd.f32 %v4938_v5, %v1949_v41  ;;  %v4259_v57 = vld [vmem:[#allocation8 + $0x1f4] sm:$0xf]  ;;  %v3951_v60 = vld [vmem:[#allocation8 + $0x1a8] sm:$0xf0] }
 0x184   : > { %2614 = vmatpush.bf16.msrb.mxu3 %v3950_v0  ;;  %v3994_v28 = vor.u32 %v4259_v57, %v3991_v25  ;;  %v2037_v53 = vadd.f32 %v4952_v10, %v2018_v33  ;;  %v4247_v41 = vld [vmem:[#allocation8 + $0x194] sm:$0xf] }
 0x185   : > { %v2128_v38 = vmul.f32 0.2, %v1982_v40  ;;  %v3946_v9 = vor.u32 %v4247_v41, %v3943_v8 }
 0x187   : > { %v2144_v63 = vmax.f32 %v1982_v40, %v2128_v38  ;;  %v2001_v40 = vadd.f32 %v4955_v45, %v4969_v47 }
 0x188   : > { %2615 = vmatpush.bf16.msrb.mxu3 %v3942_v55 }
 0x189   : > { %v4961_v3 = vpack.c.bf16 %v2144_v63, %v2140_v62  ;;  %v2019_v13 = vpop.f32.mrf.mxu2  ;;  %v4963_v52 = vpop.f32.mrf.mxu1  ;;  %v3959_v62 = vld [vmem:[#allocation8 + $0x1b8] sm:$0xf0] }
 0x18a   : > { %v1984_v4 = vpop.f32.mrf.mxu0  ;;  %v2020_v16 = vadd.f32 %v2019_v13, %v2001_v40  ;;  %v3962_v0 = vor.u32 %v4251_v61, %v3959_v62  ;;  %v2004_v10 = vadd.f32 %v4963_v52, %v4969_v47  ;;  %v3954_v13 = vor.u32 %v4249_v39, %v3951_v60  ;;  %v4245_v52 = vld [vmem:[#allocation8 + $0x184] sm:$0xf] }
 0x18b   : > { %v2038_v26 = vpop.f32.mrf.mxu3  ;;  %2598 = vmatmul.bf16.vlgmr.msrb.gmra.mxu2 %v4961_v3  ;;  %v1985_v24 = vadd.f32 %v1984_v4, %v1966_v42 }
 0x18c   : > { %2616 = vmatpush.bf16.msrb.mxu3 %v3934_v11  ;;  %v2039_v15 = vadd.f32 %v2038_v26, %v2020_v16 }
 0x18d   : > { %v2132_v56 = vmul.f32 0.2, %v1985_v24 }
 0x18f   : > { %v2148_v5 = vmax.f32 %v1985_v24, %v2132_v56  ;;  %v3935_v24 = vld [vmem:[#allocation8 + $0x188] sm:$0xf0] }
 0x190   : > { %2685 = vmatpush.bf16.msra.mxu3 %v3994_v28  ;;  %v3938_v57 = vor.u32 %v4245_v52, %v3935_v24 }
 0x191   : > { %v2022_v34 = vpop.f32.mrf.mxu2  ;;  %v4974_v23 = vpop.f32.mrf.mxu1 }
 0x192   : > { %v1986_v21 = vpop.f32.mrf.mxu0  ;;  %v2023_v4 = vadd.f32 %v2022_v34, %v2004_v10  ;;  %v2006_v14 = vadd.f32 %v4974_v23, %v4969_v47 }
 0x193   : > { %v4972_v18 = vpop.f32.mrf.mxu3  ;;  %v1987_v27 = vadd.f32 %v1986_v21, %v1968_v7 }
 0x194   : > { %2686 = vmatpush.bf16.msra.mxu3 %v3986_v30  ;;  %v2042_v11 = vadd.f32 %v4972_v18, %v2023_v4 }
 0x195   : > { %v2136_v19 = vmul.f32 0.2, %v1987_v27 }
 0x197   : > { %v2152_v32 = vmax.f32 %v1987_v27, %v2136_v19 }
 0x198   : > { %2687 = vmatpush.bf16.msra.mxu3 %v3978_v2 }
 0x199   : > { %v2024_v51 = vpop.f32.mrf.mxu2  ;;  %v4981_v17 = vpack.c.bf16 %v2152_v32, %v2148_v5  ;;  %v2074_v36 = vpop.f32.mrf.mxu1 }
 0x19a   : > { %v2055_v37 = vpop.f32.mrf.mxu0  ;;  %v2025_v25 = vadd.f32 %v2024_v51, %v2006_v14  ;;  %v2720_v14 = vld [vmem:[%s5034_s5] sm:$0x3] }
 0x19b   : > { %v4979_v35 = vpop.f32.mrf.mxu3  ;;  %2603 = vmatmul.bf16.gmra.mxu2 %v4981_v17  ;;  %v2056_v46 = vadd.f32 %v2055_v37, %v2037_v53 }
 0x19c   : > { %2688 = vmatpush.bf16.msra.mxu3 %v3970_v43  ;;  %v2044_v31 = vadd.f32 %v4979_v35, %v2025_v25 }
 0x19d   : > { %v2075_v6 = vadd.f32 %v2074_v36, %v2056_v46 }
 0x1a0   : > { %2689 = vmatpush.bf16.msra.mxu3 %v3962_v0  ;;  %v2226_v0 = vld [vmem:[%s5033_s4] sm:$0x3] }
 0x1a1   : > { %v2093_v38 = vpop.f32.mrf.mxu2  ;;  %v2076_v63 = vpop.f32.mrf.mxu1 }
 0x1a2   : > { %v2057_v54 = vpop.f32.mrf.mxu0  ;;  %v2094_v45 = vadd.f32 %v2093_v38, %v2075_v6 }
 0x1a3   : > { %v2112_v50 = vpop.f32.mrf.mxu3  ;;  %v2058_v1 = vadd.f32 %v2057_v54, %v2039_v15 }
 0x1a4   : > { %v2113_v49 = vadd.f32 %v2112_v50, %v2094_v45  ;;  %2690 = vmatpush.bf16.msra.mxu3 %v3954_v13  ;;  %v2228_v45 = vperm.slane %v2226_v0, 0 }
 0x1a5   : > { %v2077_v59 = vadd.f32 %v2076_v63, %v2058_v1 }
 0x1a6   : > { %v2125_v7 = vmul.f32 0.2, %v2113_v49 }
 0x1a8   : > { %2691 = vmatpush.bf16.msra.mxu3 %v3946_v9  ;;  %v2141_v28 = vmax.f32 %v2113_v49, %v2125_v7  ;;  %v2229_v49 = vperm.slane %v2226_v0, 1 }
 0x1a9   : > { %v2095_v58 = vpop.f32.mrf.mxu2  ;;  %v2079_v21 = vpop.f32.mrf.mxu1 }
 0x1aa   : > { %v2096_v55 = vadd.f32 %v2095_v58, %v2077_v59  ;;  %v2060_v42 = vpop.f32.mrf.mxu0 }
 0x1ab   : > { %v2114_v26 = vpop.f32.mrf.mxu3  ;;  %2674 = vmatmul.bf16.vlgmr.msra.gmra.mxu2 %v4961_v3  ;;  %v2061_v27 = vadd.f32 %v2060_v42, %v2042_v11 }
 0x1ac   : > { %v2115_v34 = vadd.f32 %v2114_v26, %v2096_v55  ;;  %2692 = vmatpush.bf16.msra.mxu3 %v3938_v57 }
 0x1ad   : > { %v2080_v18 = vadd.f32 %v2079_v21, %v2061_v27 }
 0x1ae   : > { %v2129_v56 = vmul.f32 0.2, %v2115_v34 }
 0x1b0   : > { %v2145_v29 = vmax.f32 %v2115_v34, %v2129_v56  ;;  %v2722_v56 = vperm.slane %v2720_v14, 0 }
 0x1b1   : > { %v2098_v19 = vpop.f32.mrf.mxu2  ;;  %v2081_v23 = vpop.f32.mrf.mxu1 }
 0x1b2   : > { %v2157_v22 = vpack.c.bf16 %v2145_v29, %v2141_v28  ;;  %v2062_v5 = vpop.f32.mrf.mxu0  ;;  %v2099_v32 = vadd.f32 %v2098_v19, %v2080_v18  ;;  %v2723_v19 = vperm.slane %v2720_v14, 1  ;;  %v4340_v14 = vld [vmem:[#allocation2] ss:$0 sm:$0xff] }
 0x1b3   : > { %v2117_v3 = vpop.f32.mrf.mxu3  ;;  %v2063_v47 = vadd.f32 %v2062_v5, %v2044_v31 }
 0x1b4   : > { %2617 = vmatmul.bf16.vlgmr.msrb.gmra.mxu3 %v2157_v22  ;;  %v2118_v30 = vadd.f32 %v2117_v3, %v2099_v32 }
 0x1b5   : > { %v2082_v33 = vadd.f32 %v2081_v23, %v2063_v47 }
 0x1b6   : > { %v2133_v44 = vmul.f32 0.2, %v2118_v30 }
 0x1b8   : > { %v2149_v53 = vmax.f32 %v2118_v30, %v2133_v44 }
 0x1b9   : > { %v2100_v37 = vpop.f32.mrf.mxu2 }
 0x1ba   : > { %v2101_v51 = vadd.f32 %v2100_v37, %v2082_v33  ;;  %v2561_v16 = vpop.f32.mrf.mxu0 }
 0x1bb   : > { %v2119_v36 = vpop.f32.mrf.mxu3  ;;  %2679 = vmatmul.bf16.gmra.mxu2 %v4981_v17  ;;  %v2562_v60 = vadd.f32 %v2561_v16, %v2228_v45 }
 0x1bc   : > { %v2120_v20 = vadd.f32 %v2119_v36, %v2101_v51 }
 0x1be   : > { %v2137_v2 = vmul.f32 0.2, %v2120_v20 }
 0x1c0   : > { %v2153_v40 = vmax.f32 %v2120_v20, %v2137_v2 }
 0x1c2   : > { %v2161_v35 = vpack.c.bf16 %v2153_v40, %v2149_v53  ;;  %v2563_v48 = vpop.f32.mrf.mxu0 }
 0x1c3   : > { %v2564_v41 = vadd.f32 %v2563_v48, %v2228_v45 }
 0x1c4   : > { %2622 = vmatmul.bf16.gmra.mxu3 %v2161_v35 }
 0x1ca   : > { %v2580_v46 = vpop.f32.mrf.mxu1  ;;  %v2566_v50 = vpop.f32.mrf.mxu0 }
 0x1cb   : > { %v2581_v4 = vadd.f32 %v2580_v46, %v2562_v60  ;;  %v2567_v3 = vadd.f32 %v2566_v50, %v2228_v45 }
 0x1d2   : > { %v2582_v43 = vpop.f32.mrf.mxu1  ;;  %v2568_v17 = vpop.f32.mrf.mxu0 }
 0x1d3   : > { %v2583_v52 = vadd.f32 %v2582_v43, %v2564_v41  ;;  %v2569_v16 = vadd.f32 %v2568_v17, %v2228_v45 }
 0x1d4   : > { %2693 = vmatmul.bf16.vlgmr.msra.gmra.mxu3 %v2157_v22 }
 0x1da   : > { %v2585_v15 = vpop.f32.mrf.mxu1  ;;  %v2637_v1 = vpop.f32.mrf.mxu0 }
 0x1db   : > { %v2638_v26 = vadd.f32 %v2637_v1, %v2229_v49  ;;  %v2586_v18 = vadd.f32 %v2585_v15, %v2567_v3 }
 0x1e2   : > { %v2587_v62 = vpop.f32.mrf.mxu1  ;;  %v2639_v42 = vpop.f32.mrf.mxu0 }
 0x1e3   : > { %v2640_v25 = vadd.f32 %v2639_v42, %v2229_v49  ;;  %v2588_v48 = vadd.f32 %v2587_v62, %v2569_v16 }
 0x1e4   : > { %2698 = vmatmul.bf16.gmra.mxu3 %v2161_v35 }
 0x1ea   : > { %v2656_v39 = vpop.f32.mrf.mxu1  ;;  %v2642_v5 = vpop.f32.mrf.mxu0 }
 0x1eb   : > { %v2657_v8 = vadd.f32 %v2656_v39, %v2638_v26  ;;  %v2643_v2 = vadd.f32 %v2642_v5, %v2229_v49 }
 0x1f2   : > { %v2658_v9 = vpop.f32.mrf.mxu1 }
 0x1f3   : > { %v2659_v31 = vadd.f32 %v2658_v9, %v2640_v25 }
 0x1fa   : > { %v2661_v33 = vpop.f32.mrf.mxu1 }
 0x1fb   : > { %v2662_v46 = vadd.f32 %v2661_v33, %v2643_v2 }
 0x202   : > { %v2663_v39 = vpop.f32.mrf.mxu1 }
 0x20e   : > { %v2599_v12 = vpop.f32.mrf.mxu2 }
 0x20f   : > { %v2600_v58 = vadd.f32 %v2599_v12, %v2581_v4 }
 0x216   : > { %v2601_v38 = vpop.f32.mrf.mxu2 }
 0x217   : > { %v2602_v21 = vadd.f32 %v2601_v38, %v2583_v52 }
 0x21e   : > { %v2604_v54 = vpop.f32.mrf.mxu2 }
 0x21f   : > { %v2605_v51 = vadd.f32 %v2604_v54, %v2586_v18 }
 0x226   : > { %v2606_v63 = vpop.f32.mrf.mxu2 }
 0x227   : > { %v2607_v0 = vadd.f32 %v2606_v63, %v2588_v48 }
 0x22e   : > { %v2675_v13 = vpop.f32.mrf.mxu2 }
 0x22f   : > { %v2676_v24 = vadd.f32 %v2675_v13, %v2657_v8 }
 0x236   : > { %v2677_v7 = vpop.f32.mrf.mxu2 }
 0x237   : > { %v2618_v6 = vpop.f32.mrf.mxu3  ;;  %v2678_v32 = vadd.f32 %v2677_v7, %v2659_v31 }
 0x238   : > { %v2619_v55 = vadd.f32 %v2618_v6, %v2600_v58  ;;  %v2644_v6 = vpop.f32.mrf.mxu0 }
 0x239   : > { %v2645_v60 = vadd.f32 %v2644_v6, %v2229_v49 }
 0x23a   : > { %v2704_v11 = vmul.f32 0.2, %v2619_v55 }
 0x23b   : > { %v2664_v17 = vadd.f32 %v2663_v39, %v2645_v60 }
 0x23c   : > { %v2712_v27 = vmax.f32 %v2619_v55, %v2704_v11 }
 0x23e   : > { %v2726_v23 = vmul.f32 %v2722_v56, %v2712_v27  ;;  %v2680_v20 = vpop.f32.mrf.mxu2 }
 0x23f   : > { %v2620_v61 = vpop.f32.mrf.mxu3  ;;  %v2681_v43 = vadd.f32 %v2680_v20, %v2662_v46 }
 0x240   : > { %v2621_v28 = vadd.f32 %v2620_v61, %v2602_v21 }
 0x242   : > { %v2706_v47 = vmul.f32 0.2, %v2621_v28 }
 0x244   : > { %v2714_v53 = vmax.f32 %v2621_v28, %v2706_v47 }
 0x246   : > { %v2728_v50 = vmul.f32 %v2722_v56, %v2714_v53  ;;  %v2682_v58 = vpop.f32.mrf.mxu2 }
 0x247   : > { %v2623_v10 = vpop.f32.mrf.mxu3  ;;  %v2683_v26 = vadd.f32 %v2682_v58, %v2664_v17 }
 0x248   : > { %v2624_v40 = vadd.f32 %v2623_v10, %v2605_v51 }
 0x24a   : > { %v2708_v38 = vmul.f32 0.2, %v2624_v40 }
 0x24c   : > { %v2716_v13 = vmax.f32 %v2624_v40, %v2708_v38 }
 0x24e   : > { %v2730_v55 = vmul.f32 %v2722_v56, %v2716_v13 }
 0x24f   : > { %v2625_v59 = vpop.f32.mrf.mxu3 }
 0x250   : > { %v2626_v4 = vadd.f32 %v2625_v59, %v2607_v0 }
 0x252   : > { %v2710_v62 = vmul.f32 0.2, %v2626_v4 }
 0x254   : > { %v2718_v52 = vmax.f32 %v2626_v4, %v2710_v62 }
 0x256   : > { %v2732_v49 = vmul.f32 %v2722_v56, %v2718_v52 }
 0x257   : > { %v2694_v34 = vpop.f32.mrf.mxu3 }
 0x258   : > { %v2695_v57 = vadd.f32 %v2694_v34, %v2676_v24 }
 0x25a   : > { %v2705_v29 = vmul.f32 0.2, %v2695_v57 }
 0x25c   : > { %v2713_v22 = vmax.f32 %v2695_v57, %v2705_v29 }
 0x25e   : > { %v2727_v30 = vmul.f32 %v2723_v19, %v2713_v22 }
 0x25f   : > { %v2696_v37 = vpop.f32.mrf.mxu3 }
 0x260   : > { %v2697_v36 = vadd.f32 %v2696_v37, %v2678_v32  ;;  %v2734_v44 = vadd.f32 %v2727_v30, %v2726_v23 }
 0x262   : > { %v2707_v35 = vmul.f32 0.2, %v2697_v36  ;;  %2735 = vadd.xlane.f32.xlu0 %v2734_v44 }
 0x264   : > { %v2715_v12 = vmax.f32 %v2697_v36, %v2707_v35 }
 0x266   : > { %v2729_v15 = vmul.f32 %v2723_v19, %v2715_v12 }
 0x267   : > { %v2699_v61 = vpop.f32.mrf.mxu3 }
 0x268   : > { %v2700_v54 = vadd.f32 %v2699_v61, %v2681_v43  ;;  %v2737_v1 = vadd.f32 %v2729_v15, %v2728_v50 }
 0x26a   : > { %v2709_v10 = vmul.f32 0.2, %v2700_v54  ;;  %2738 = vadd.xlane.f32.xlu0 %v2737_v1 }
 0x26c   : > { %v2717_v45 = vmax.f32 %v2700_v54, %v2709_v10 }
 0x26e   : > { %v2731_v42 = vmul.f32 %v2723_v19, %v2717_v45 }
 0x26f   : > { %v2701_v41 = vpop.f32.mrf.mxu3 }
 0x270   : > { %v2702_v8 = vadd.f32 %v2701_v41, %v2683_v26  ;;  %v2740_v9 = vadd.f32 %v2731_v42, %v2730_v55 }
 0x272   : > { %v2711_v63 = vmul.f32 0.2, %v2702_v8  ;;  %2741 = vadd.xlane.f32.xlu1 %v2740_v9 }
 0x274   : > { %v2719_v24 = vmax.f32 %v2702_v8, %v2711_v63 }
 0x276   : > { %v2733_v11 = vmul.f32 %v2723_v19, %v2719_v24 }
 0x278   : > { %v2743_v59 = vadd.f32 %v2733_v11, %v2732_v49 }
 0x27a   : > { %2744 = vadd.xlane.f32.xlu1 %v2743_v59 }
 0x2d5   : > { %v2736_v7 = vpop.xlane.xlu0 %2735 }
 0x2d6   : > { %v2750_v34 = vadd.f32 %v4340_v14, %v2736_v7 }
 0x2d8   : > { %v3995_v21 = vmul.f32 -1.442695, %v2750_v34 }
 0x2da   : > { %4341 = vpow2.f32 %v3995_v21 }
 0x2dd   : > { %v2739_v57 = vpop.xlane.xlu0 %2738 }
 0x2de   : > { %v2751_v25 = vadd.f32 %v4340_v14, %v2739_v57 }
 0x2e0   : > { %v4342_v27 = vpop.eup %4341  ;;  %v3996_v28 = vmul.f32 -1.442695, %v2751_v25 }
 0x2e1   : > { %v2766_v29 = vadd.f32 1.0, %v4342_v27 }
 0x2e2   : > { %4343 = vpow2.f32 %v3996_v28 }
 0x2e3   : > { %4345 = vrcp.f32 %v2766_v29  ;;  %v2781_v47 = vand.u32 2147483648, %v2766_v29  ;;  %v2779_v33 = vand.u32 2147483647, %v2766_v29  ;;  %vm2775_vm2 = vweird.f32 %v2766_v29 }
 0x2e5   : > { %v2742_v3 = vpop.xlane.xlu1 %2741  ;;  %v2782_v2 = vor.u32 1.1754944e-38, %v2781_v47  ;;  %vm2780_vm5 = vcmp.eq.f32.partialorder %v2779_v33, 8.507059e+37 }
 0x2e6   : > { %v2752_v56 = vadd.f32 %v4340_v14, %v2742_v3 }
 0x2e8   : > { %v4344_v19 = vpop.eup %4343  ;;  %v3997_v31 = vmul.f32 -1.442695, %v2752_v56 }
 0x2e9   : > { %v4346_v22 = vpop.eup %4345  ;;  %v2767_v18 = vadd.f32 1.0, %v4344_v19 }
 0x2ea   : > { %v2771_v5 = vmul.f32 %v4346_v22, %v2766_v29  ;;  %4347 = vpow2.f32 %v3997_v31  ;;  %vm2776_vm1 = vweird.f32 %v4346_v22 }
 0x2eb   : > { %4349 = vrcp.f32 %v2767_v18  ;;  %vm2777_vm4 = vmor %vm2775_vm2, %vm2776_vm1  ;;  %v2796_v12 = vand.u32 2147483648, %v2767_v18  ;;  %v2794_v43 = vand.u32 2147483647, %v2767_v18  ;;  %vm2790_vm7 = vweird.f32 %v2767_v18 }
 0x2ec   : > { %v2772_v32 = vsub.f32 1.0, %v2771_v5 }
 0x2ed   : > { %v2745_v23 = vpop.xlane.xlu1 %2744  ;;  %v2797_v6 = vor.u32 1.1754944e-38, %v2796_v12  ;;  %vm2795_vm9 = vcmp.eq.f32.partialorder %v2794_v43, 8.507059e+37 }
 0x2ee   : > { %v2773_v30 = vmul.f32 %v4346_v22, %v2772_v32  ;;  %v2753_v37 = vadd.f32 %v4340_v14, %v2745_v23 }
 0x2f0   : > { %v4348_v51 = vpop.eup %4347  ;;  %v2774_v36 = vadd.f32 %v4346_v22, %v2773_v30  ;;  %v3998_v44 = vmul.f32 -1.442695, %v2753_v37 }
 0x2f1   : > { %v4350_v20 = vpop.eup %4349  ;;  %v2768_v53 = vadd.f32 1.0, %v4348_v51 }
 0x2f2   : > { %v2778_v40 = vsel %vm2777_vm4, %v4346_v22, %v2774_v36  ;;  %v2786_v35 = vmul.f32 %v4350_v20, %v2767_v18  ;;  %4351 = vpow2.f32 %v3998_v44  ;;  %vm2791_vm6 = vweird.f32 %v4350_v20 }
 0x2f3   : > { %v2783_v16 = vsel %vm2780_vm5, %v2782_v2, %v2778_v40  ;;  %4353 = vrcp.f32 %v2768_v53  ;;  %vm2792_vm8 = vmor %vm2790_vm7, %vm2791_vm6  ;;  %v2811_v60 = vand.u32 2147483648, %v2768_v53  ;;  %v2809_v4 = vand.u32 2147483647, %v2768_v53 }
 0x2f4   : > { %2831 = vst.msk [vmem:[%s5006_s9] sm:$0xff] %vm2830_vm3, %v2783_v16  ;;  %v2787_v46 = vsub.f32 1.0, %v2786_v35  ;;  %vm2805_vm11 = vweird.f32 %v2768_v53 }
 0x2f5   : > { %v2812_v17 = vor.u32 1.1754944e-38, %v2811_v60  ;;  %vm2810_vm13 = vcmp.eq.f32.partialorder %v2809_v4, 8.507059e+37 }
 0x2f6   : > { %v2788_v48 = vmul.f32 %v4350_v20, %v2787_v46 }
 0x2f8   : > { %v4352_v38 = vpop.eup %4351  ;;  %v2789_v50 = vadd.f32 %v4350_v20, %v2788_v48 }
 0x2f9   : > { %v4354_v15 = vpop.eup %4353  ;;  %v2769_v61 = vadd.f32 1.0, %v4352_v38 }
 0x2fa   : > { %v2793_v0 = vsel %vm2792_vm8, %v4350_v20, %v2789_v50  ;;  %v2801_v54 = vmul.f32 %v4354_v15, %v2768_v53  ;;  %vm2806_vm10 = vweird.f32 %v4354_v15 }
 0x2fb   : > { %v2798_v1 = vsel %vm2795_vm9, %v2797_v6, %v2793_v0  ;;  %4355 = vrcp.f32 %v2769_v61  ;;  %vm2807_vm12 = vmor %vm2805_vm11, %vm2806_vm10  ;;  %v2826_v42 = vand.u32 2147483648, %v2769_v61  ;;  %v2824_v8 = vand.u32 2147483647, %v2769_v61 }
 0x2fc   : > { %2832 = vst.msk [vmem:[%s5006_s9 + $0x8] sm:$0xff] %vm2830_vm3, %v2798_v1  ;;  %v2802_v39 = vsub.f32 1.0, %v2801_v54  ;;  %vm2820_vm15 = vweird.f32 %v2769_v61 }
 0x2fd   : > { %v2827_v52 = vor.u32 1.1754944e-38, %v2826_v42  ;;  %vm2825_vm1 = vcmp.eq.f32.partialorder %v2824_v8, 8.507059e+37 }
 0x2fe   : > { %v2803_v13 = vmul.f32 %v4354_v15, %v2802_v39 }
 0x300   : > { %v2804_v10 = vadd.f32 %v4354_v15, %v2803_v13 }
 0x301   : > { %v4356_v58 = vpop.eup %4355 }
 0x302   : > { %v2808_v45 = vsel %vm2807_vm12, %v4354_v15, %v2804_v10  ;;  %v2816_v26 = vmul.f32 %v4356_v58, %v2769_v61  ;;  %vm2821_vm14 = vweird.f32 %v4356_v58 }
 0x303   : > { %v2813_v62 = vsel %vm2810_vm13, %v2812_v17, %v2808_v45  ;;  %vm2822_vm0 = vmor %vm2820_vm15, %vm2821_vm14 }
 0x304   : > { %2833 = vst.msk [vmem:[%s5006_s9 + $0x10] sm:$0xff] %vm2830_vm3, %v2813_v62  ;;  %v2817_v55 = vsub.f32 1.0, %v2816_v26 }
 0x306   : > { %v2818_v41 = vmul.f32 %v4356_v58, %v2817_v55 }
 0x308   : > { %v2819_v9 = vadd.f32 %v4356_v58, %v2818_v41 }
 0x30a   : > { %v2823_v63 = vsel %vm2822_vm0, %v4356_v58, %v2819_v9 }
 0x30b   : > { %v2828_v24 = vsel %vm2825_vm1, %v2827_v52, %v2823_v63 }
 0x30c   : > { %2834 = vst.msk [vmem:[%s5006_s9 + $0x18] sm:$0xff] %vm2830_vm3, %v2828_v24 }
 0x30d PF: > { %p21_p4 = scmp.ge.s32.totalorder %s4636_s13, 4   ;;  %s5042_s26 = smov %s4512_s27 }
 0x30e   : > { %s5043_s27 = smov %s4516_s28  ;;  %s5044_s28 = smov %s4646_s17 }
 0x30f   : > { %s5045_s29 = smov %s4636_s13  ;;  %23 = sbr.rel (!%p21_p4) target bundleno = 8 (0x8), region = 100 }
 0x314   :  { %2857 = vsyncpa [#allocation4], 1 }
 0x315   :  { %2859 = vsyncpa [#allocation4 + $0x1], 1 }
 0x316   :  { %2860 = vsyncpa [#allocation6], 1 }
 0x317   :  { %2861 = vsyncpa [#allocation9], 1 }

</bundles_post_ra>
